<compile_context>
chip_gen: v5e
topology: v5e:2x2
jax: 0.10.0
libtpu: 0.0.40
codegen_flags: <defaults>
</compile_context>

<pallas_src>
import functools

import numpy as np
import jax
import jax.numpy as jnp
from jax.experimental import pallas as pl
from jax.experimental.pallas import tpu as pltpu


OUT_PAD = 128   # lane-dense output slab width (>= 128 for unmasked vst)
SUBLANE = 8     # f32 sublane granularity


def _round_up(n, m):
    return ((n + m - 1) // m) * m


def lstm_fc_kernel(T, B, hidden_dim, num_layers,
                   x_ref, wih0_ref, b0_ref, whh0_ref,
                   wih_ref, whh_ref, bl_ref,
                   wfc_ref, bfc_ref, out_ref):
    """Whole multi-layer LSTM recurrence + final Linear, inside one kernel.

    x_ref    : (T*B, D)              time-major input, time flattened into rows (B = padded batch)
    wih0_ref : (D, 4H)               layer-0 input weights (transposed)
    b0_ref   : (1, 4H)               combined layer-0 bias (b_ih0 + b_hh0)
    whh0_ref : (H, 4H)               layer-0 hidden weights (transposed)
    wih_ref  : (max(L-1,1), H, 4H)   input weights for layers >= 1 (transposed)
    whh_ref  : (max(L-1,1), H, 4H)   hidden weights for layers >= 1 (transposed)
    bl_ref   : (max(L-1,1), 1, 4H)   combined biases for layers >= 1
    wfc_ref  : (H, OUT_PAD)          fc weight, zero-padded to 128 lanes
    bfc_ref  : (1, OUT_PAD)          fc bias, zero-padded
    out_ref  : (B, OUT_PAD)          lane-dense output slab (column 0 is the result)
    """
    H = hidden_dim
    L = num_layers
    G = 4 * H

    # --- Hoisted, non-recurrent layer-0 input projection: one big MXU matmul with the
    #     combined layer-0 bias folded in.  Kept as a value (T*B x 4H) — no VMEM scratch.
    xproj = (jnp.dot(x_ref[...], wih0_ref[...], preferred_element_type=jnp.float32)
             + b0_ref[...])

    # Hoist weights into live vregs only while they are small enough to not force spills
    # across the fully-unrolled T loop; otherwise re-read from VMEM inside the body.
    hoist_weights = (H * G * 4) <= 16 * 1024
    if hoist_weights:
        whh0_v = whh0_ref[...]                                    # (H, 4H)
        wih_v = [wih_ref[l] for l in range(L - 1)]                # each (H, 4H)
        whh_v = [whh_ref[l] for l in range(L - 1)]
    # Biases are tiny (one vreg each after broadcast): always hoist, broadcast once.
    b_l = [jnp.broadcast_to(bl_ref[l], (B, G)) for l in range(L - 1)]

    def cell(gates, c_prev):
        # Full-vreg sigmoid / tanh once (EUP), then select the 32-lane gate chunks.
        sig = jax.nn.sigmoid(gates)
        tnh = jnp.tanh(gates)
        i_g = sig[:, 0 * H:1 * H]
        f_g = sig[:, 1 * H:2 * H]
        g_g = tnh[:, 2 * H:3 * H]
        o_g = sig[:, 3 * H:4 * H]
        c_new = f_g * c_prev + i_g * g_g
        h_new = o_g * jnp.tanh(c_new)
        return h_new, c_new

    h = [jnp.zeros((B, H), jnp.float32) for _ in range(L)]
    c = [jnp.zeros((B, H), jnp.float32) for _ in range(L)]

    # --- Fully-unrolled time loop: static, whole-vreg slices of the hoisted projection.
    for t in range(T):
        xp = xproj[t * B:(t + 1) * B, :]                          # (B, 4H), aligned vreg(s)

        # Layer 0: only the recurrent matmul remains on the critical path.
        whh0_t = whh0_v if hoist_weights else whh0_ref[...]
        gates = xp + jnp.dot(h[0], whh0_t, preferred_element_type=jnp.float32)
        h[0], c[0] = cell(gates, c[0])

        # Layers >= 1: two back-to-back K=H MXU pushes (no lane-concat on the crit path).
        for l in range(1, L):
            wi = wih_v[l - 1] if hoist_weights else wih_ref[l - 1]
            wh = whh_v[l - 1] if hoist_weights else whh_ref[l - 1]
            gates = (jnp.dot(h[l - 1], wi, preferred_element_type=jnp.float32)
                     + jnp.dot(h[l], wh, preferred_element_type=jnp.float32)
                     + b_l[l - 1])
            h[l], c[l] = cell(gates, c[l])

    # fc(lstm_out[:, -1, :]) == fc(top-layer h at the last timestep); lane-padded output.
    out_ref[...] = (jnp.dot(h[L - 1], wfc_ref[...], preferred_element_type=jnp.float32)
                    + bfc_ref[...])


def init_params(key, input_dim, hidden_dim, num_layers):
    """Deterministic init mirroring PyTorch's U(-1/sqrt(H), 1/sqrt(H)).

    Returns (packed_params_for_kernel, raw_pytorch_layout_params_for_reference).
    """
    H = hidden_dim
    G = 4 * H
    bound = 1.0 / np.sqrt(H)
    keys = list(jax.random.split(key, 4 * num_layers + 2))

    def u(k, shape):
        return jax.random.uniform(k, shape, jnp.float32, -bound, bound)

    w_ih, w_hh, b_ih, b_hh = [], [], [], []
    for l in range(num_layers):
        in_dim = input_dim if l == 0 else H
        w_ih.append(u(keys[4 * l + 0], (G, in_dim)))
        w_hh.append(u(keys[4 * l + 1], (G, H)))
        b_ih.append(u(keys[4 * l + 2], (G,)))
        b_hh.append(u(keys[4 * l + 3], (G,)))
    w_fc = u(keys[-2], (1, H))
    b_fc = u(keys[-1], (1,))
    raw = (w_ih, w_hh, b_ih, b_hh, w_fc, b_fc)

    # --- Packing / pre-transposition for the kernel -------------------------------
    wih0_T = w_ih[0].T                                             # (D, 4H)
    b0 = (b_ih[0] + b_hh[0]).reshape(1, G)                         # folded into x-projection
    whh0_T = w_hh[0].T                                             # (H, 4H)
    if num_layers > 1:
        wih_stack = jnp.stack([w_ih[l].T for l in range(1, num_layers)])   # (L-1, H, 4H)
        whh_stack = jnp.stack([w_hh[l].T for l in range(1, num_layers)])   # (L-1, H, 4H)
        b_stack = jnp.stack([(b_ih[l] + b_hh[l]).reshape(1, G)
                             for l in range(1, num_layers)])               # (L-1, 1, 4H)
    else:
        wih_stack = jnp.zeros((1, H, G), jnp.float32)              # unused dummies
        whh_stack = jnp.zeros((1, H, G), jnp.float32)
        b_stack = jnp.zeros((1, 1, G), jnp.float32)
    wfc_pad = jnp.zeros((H, OUT_PAD), jnp.float32).at[:, 0].set(w_fc[0])
    bfc_pad = jnp.zeros((1, OUT_PAD), jnp.float32).at[0, 0].set(b_fc[0])

    packed = (wih0_T, b0, whh0_T, wih_stack, whh_stack, b_stack, wfc_pad, bfc_pad)
    return packed, raw


def lstm_model_forward(x, packed_params, hidden_dim, num_layers):
    """x: (B, T, D) batch-first, like the PyTorch module. Returns (B, 1)."""
    B, T, D = x.shape

    # Pad the batch to the 8-row sublane granularity (zero-filled rows, sliced off below).
    B_pad = max(SUBLANE, _round_up(B, SUBLANE))
    x_pad = jnp.zeros((B_pad, T, D), x.dtype).at[:B].set(x)
    # Time-major, time flattened into rows so the in-kernel projection is one matmul.
    x_flat = jnp.transpose(x_pad, (1, 0, 2)).reshape(T * B_pad, D)

    kernel = functools.partial(lstm_fc_kernel, T, B_pad, hidden_dim, num_layers)
    vmem = pl.BlockSpec(memory_space=pltpu.MemorySpace.VMEM)

    out_pad = pl.pallas_call(
        kernel,
        out_shape=jax.ShapeDtypeStruct((B_pad, OUT_PAD), jnp.float32),
        in_specs=[vmem] * 9,
        out_specs=vmem,
    )(x_flat, *packed_params)
    return out_pad[:B, :1]


def lstm_model_reference(x, raw_params, hidden_dim, num_layers):
    """Pure-JAX reference in the raw PyTorch weight layout (validates packing too)."""
    w_ih, w_hh, b_ih, b_hh, w_fc, b_fc = raw_params
    B, T, D = x.shape
    H = hidden_dim
    h = [jnp.zeros((B, H), jnp.float32) for _ in range(num_layers)]
    c = [jnp.zeros((B, H), jnp.float32) for _ in range(num_layers)]
    inp = None
    for t in range(T):
        inp = x[:, t, :]
        for l in range(num_layers):
            gates = inp @ w_ih[l].T + h[l] @ w_hh[l].T + b_ih[l] + b_hh[l]
            i_g = jax.nn.sigmoid(gates[:, :H])
            f_g = jax.nn.sigmoid(gates[:, H:2 * H])
            g_g = jnp.tanh(gates[:, 2 * H:3 * H])
            o_g = jax.nn.sigmoid(gates[:, 3 * H:])
            c[l] = f_g * c[l] + i_g * g_g
            h[l] = o_g * jnp.tanh(c[l])
            inp = h[l]
    return inp @ w_fc.T + b_fc


if __name__ == "__main__":
    # Small shapes consistent with the module: batch=2, seq=8, input_dim=4,
    # hidden_dim=32, num_layers=2, dropout=0.1 (identity at inference).
    B, T, D, H, L = 2, 8, 4, 32, 2

    key = jax.random.PRNGKey(0)
    k_x, k_p = jax.random.split(key)
    x = jax.random.normal(k_x, (B, T, D), jnp.float32)
    packed, raw = init_params(k_p, D, H, L)

    out = lstm_model_forward(x, packed, H, L)
    out = jax.block_until_ready(out)

    ref = lstm_model_reference(x, raw, H, L)
    np.testing.assert_allclose(np.asarray(out), np.asarray(ref),
                               rtol=1e-5, atol=1e-5)
    assert out.shape == (B, 1)
    print("KERNEL_OK")
</pallas_src>

<mosaic_0001>
module attributes {stable_mosaic.version = 11 : i64} {
  func.func @lstm_fc_kernel(%arg0: memref<64x4xf32, #tpu.memory_space<vmem>>, %arg1: memref<4x128xf32, #tpu.memory_space<vmem>>, %arg2: memref<1x128xf32, #tpu.memory_space<vmem>>, %arg3: memref<32x128xf32, #tpu.memory_space<vmem>>, %arg4: memref<1x32x128xf32, #tpu.memory_space<vmem>>, %arg5: memref<1x32x128xf32, #tpu.memory_space<vmem>>, %arg6: memref<1x1x128xf32, #tpu.memory_space<vmem>>, %arg7: memref<32x128xf32, #tpu.memory_space<vmem>>, %arg8: memref<1x128xf32, #tpu.memory_space<vmem>>, %arg9: memref<8x128xf32, #tpu.memory_space<vmem>>) attributes {dimension_semantics = [], scalar_prefetch = 0 : i64, scratch_operands = 0 : i64, tpu.core_type = #tpu.core_type<tc>} {
    %c0 = arith.constant 0 : index
    %c0_0 = arith.constant 0 : index
    %0 = vector.load %arg0[%c0, %c0_0] : memref<64x4xf32, #tpu.memory_space<vmem>>, vector<64x4xf32>
    %c0_1 = arith.constant 0 : index
    %c0_2 = arith.constant 0 : index
    %1 = vector.load %arg1[%c0_1, %c0_2] : memref<4x128xf32, #tpu.memory_space<vmem>>, vector<4x128xf32>
    %cst = arith.constant dense<0.000000e+00> : vector<64x128xf32>
    %2 = tpu.matmul %0, %1, %cst {dimension_numbers = #tpu.dot_dimension_numbers<[1], [0], [0], [1], [0, 0, 1, 1], [], []>} : vector<64x4xf32>, vector<4x128xf32>, vector<64x128xf32> -> vector<64x128xf32>
    %c0_3 = arith.constant 0 : index
    %c0_4 = arith.constant 0 : index
    %3 = vector.load %arg2[%c0_3, %c0_4] : memref<1x128xf32, #tpu.memory_space<vmem>>, vector<1x128xf32>
    %4 = vector.broadcast %3 : vector<1x128xf32> to vector<64x128xf32>
    %5 = arith.addf %2, %4 : vector<64x128xf32>
    %c0_5 = arith.constant 0 : index
    %c0_6 = arith.constant 0 : index
    %6 = vector.load %arg3[%c0_5, %c0_6] : memref<32x128xf32, #tpu.memory_space<vmem>>, vector<32x128xf32>
    %c0_7 = arith.constant 0 : index
    %c0_8 = arith.constant 0 : index
    %c0_9 = arith.constant 0 : index
    %7 = vector.load %arg4[%c0_7, %c0_8, %c0_9] : memref<1x32x128xf32, #tpu.memory_space<vmem>>, vector<1x32x128xf32>
    %8 = vector.shape_cast %7 : vector<1x32x128xf32> to vector<32x128xf32>
    %c0_10 = arith.constant 0 : index
    %c0_11 = arith.constant 0 : index
    %c0_12 = arith.constant 0 : index
    %9 = vector.load %arg5[%c0_10, %c0_11, %c0_12] : memref<1x32x128xf32, #tpu.memory_space<vmem>>, vector<1x32x128xf32>
    %10 = vector.shape_cast %9 : vector<1x32x128xf32> to vector<32x128xf32>
    %c0_13 = arith.constant 0 : index
    %c0_14 = arith.constant 0 : index
    %c0_15 = arith.constant 0 : index
    %11 = vector.load %arg6[%c0_13, %c0_14, %c0_15] : memref<1x1x128xf32, #tpu.memory_space<vmem>>, vector<1x1x128xf32>
    %12 = vector.shape_cast %11 : vector<1x1x128xf32> to vector<1x128xf32>
    %13 = vector.shape_cast %12 : vector<1x128xf32> to vector<1x128xf32>
    %14 = vector.broadcast %13 : vector<1x128xf32> to vector<8x128xf32>
    %cst_16 = arith.constant 0.000000e+00 : f32
    %15 = vector.broadcast %cst_16 : f32 to vector<8x32xf32>
    %cst_17 = arith.constant 0.000000e+00 : f32
    %16 = vector.broadcast %cst_17 : f32 to vector<8x32xf32>
    %cst_18 = arith.constant 0.000000e+00 : f32
    %17 = vector.broadcast %cst_18 : f32 to vector<8x32xf32>
    %cst_19 = arith.constant 0.000000e+00 : f32
    %18 = vector.broadcast %cst_19 : f32 to vector<8x32xf32>
    %19 = vector.extract_strided_slice %5 {offsets = [0, 0], sizes = [8, 128], strides = [1, 1]} : vector<64x128xf32> to vector<8x128xf32>
    %cst_20 = arith.constant dense<0.000000e+00> : vector<8x128xf32>
    %20 = tpu.matmul %15, %6, %cst_20 {dimension_numbers = #tpu.dot_dimension_numbers<[1], [0], [0], [1], [0, 0, 1, 1], [], []>} : vector<8x32xf32>, vector<32x128xf32>, vector<8x128xf32> -> vector<8x128xf32>
    %21 = arith.addf %19, %20 : vector<8x128xf32>
    %22 = arith.negf %21 : vector<8x128xf32>
    %23 = math.exp %22 : vector<8x128xf32>
    %cst_21 = arith.constant 1.000000e+00 : f32
    %24 = vector.broadcast %cst_21 : f32 to vector<8x128xf32>
    %25 = arith.addf %24, %23 : vector<8x128xf32>
    %26 = arith.divf %24, %25 : vector<8x128xf32>
    %27 = math.tanh %21 : vector<8x128xf32>
    %28 = vector.extract_strided_slice %26 {offsets = [0, 0], sizes = [8, 32], strides = [1, 1]} : vector<8x128xf32> to vector<8x32xf32>
    %29 = vector.extract_strided_slice %26 {offsets = [0, 32], sizes = [8, 32], strides = [1, 1]} : vector<8x128xf32> to vector<8x32xf32>
    %30 = vector.extract_strided_slice %27 {offsets = [0, 64], sizes = [8, 32], strides = [1, 1]} : vector<8x128xf32> to vector<8x32xf32>
    %31 = vector.extract_strided_slice %26 {offsets = [0, 96], sizes = [8, 32], strides = [1, 1]} : vector<8x128xf32> to vector<8x32xf32>
    %32 = arith.mulf %29, %17 : vector<8x32xf32>
    %33 = arith.mulf %28, %30 : vector<8x32xf32>
    %34 = arith.addf %32, %33 : vector<8x32xf32>
    %35 = math.tanh %34 : vector<8x32xf32>
    %36 = arith.mulf %31, %35 : vector<8x32xf32>
    %cst_22 = arith.constant dense<0.000000e+00> : vector<8x128xf32>
    %37 = tpu.matmul %36, %8, %cst_22 {dimension_numbers = #tpu.dot_dimension_numbers<[1], [0], [0], [1], [0, 0, 1, 1], [], []>} : vector<8x32xf32>, vector<32x128xf32>, vector<8x128xf32> -> vector<8x128xf32>
    %cst_23 = arith.constant dense<0.000000e+00> : vector<8x128xf32>
    %38 = tpu.matmul %16, %10, %cst_23 {dimension_numbers = #tpu.dot_dimension_numbers<[1], [0], [0], [1], [0, 0, 1, 1], [], []>} : vector<8x32xf32>, vector<32x128xf32>, vector<8x128xf32> -> vector<8x128xf32>
    %39 = arith.addf %37, %38 : vector<8x128xf32>
    %40 = arith.addf %39, %14 : vector<8x128xf32>
    %41 = arith.negf %40 : vector<8x128xf32>
    %42 = math.exp %41 : vector<8x128xf32>
    %cst_24 = arith.constant 1.000000e+00 : f32
    %43 = vector.broadcast %cst_24 : f32 to vector<8x128xf32>
    %44 = arith.addf %43, %42 : vector<8x128xf32>
    %45 = arith.divf %43, %44 : vector<8x128xf32>
    %46 = math.tanh %40 : vector<8x128xf32>
    %47 = vector.extract_strided_slice %45 {offsets = [0, 0], sizes = [8, 32], strides = [1, 1]} : vector<8x128xf32> to vector<8x32xf32>
    %48 = vector.extract_strided_slice %45 {offsets = [0, 32], sizes = [8, 32], strides = [1, 1]} : vector<8x128xf32> to vector<8x32xf32>
    %49 = vector.extract_strided_slice %46 {offsets = [0, 64], sizes = [8, 32], strides = [1, 1]} : vector<8x128xf32> to vector<8x32xf32>
    %50 = vector.extract_strided_slice %45 {offsets = [0, 96], sizes = [8, 32], strides = [1, 1]} : vector<8x128xf32> to vector<8x32xf32>
    %51 = arith.mulf %48, %18 : vector<8x32xf32>
    %52 = arith.mulf %47, %49 : vector<8x32xf32>
    %53 = arith.addf %51, %52 : vector<8x32xf32>
    %54 = math.tanh %53 : vector<8x32xf32>
    %55 = arith.mulf %50, %54 : vector<8x32xf32>
    %56 = vector.extract_strided_slice %5 {offsets = [8, 0], sizes = [8, 128], strides = [1, 1]} : vector<64x128xf32> to vector<8x128xf32>
    %cst_25 = arith.constant dense<0.000000e+00> : vector<8x128xf32>
    %57 = tpu.matmul %36, %6, %cst_25 {dimension_numbers = #tpu.dot_dimension_numbers<[1], [0], [0], [1], [0, 0, 1, 1], [], []>} : vector<8x32xf32>, vector<32x128xf32>, vector<8x128xf32> -> vector<8x128xf32>
    %58 = arith.addf %56, %57 : vector<8x128xf32>
    %59 = arith.negf %58 : vector<8x128xf32>
    %60 = math.exp %59 : vector<8x128xf32>
    %cst_26 = arith.constant 1.000000e+00 : f32
    %61 = vector.broadcast %cst_26 : f32 to vector<8x128xf32>
    %62 = arith.addf %61, %60 : vector<8x128xf32>
    %63 = arith.divf %61, %62 : vector<8x128xf32>
    %64 = math.tanh %58 : vector<8x128xf32>
    %65 = vector.extract_strided_slice %63 {offsets = [0, 0], sizes = [8, 32], strides = [1, 1]} : vector<8x128xf32> to vector<8x32xf32>
    %66 = vector.extract_strided_slice %63 {offsets = [0, 32], sizes = [8, 32], strides = [1, 1]} : vector<8x128xf32> to vector<8x32xf32>
    %67 = vector.extract_strided_slice %64 {offsets = [0, 64], sizes = [8, 32], strides = [1, 1]} : vector<8x128xf32> to vector<8x32xf32>
    %68 = vector.extract_strided_slice %63 {offsets = [0, 96], sizes = [8, 32], strides = [1, 1]} : vector<8x128xf32> to vector<8x32xf32>
    %69 = arith.mulf %66, %34 : vector<8x32xf32>
    %70 = arith.mulf %65, %67 : vector<8x32xf32>
    %71 = arith.addf %69, %70 : vector<8x32xf32>
    %72 = math.tanh %71 : vector<8x32xf32>
    %73 = arith.mulf %68, %72 : vector<8x32xf32>
    %cst_27 = arith.constant dense<0.000000e+00> : vector<8x128xf32>
    %74 = tpu.matmul %73, %8, %cst_27 {dimension_numbers = #tpu.dot_dimension_numbers<[1], [0], [0], [1], [0, 0, 1, 1], [], []>} : vector<8x32xf32>, vector<32x128xf32>, vector<8x128xf32> -> vector<8x128xf32>
    %cst_28 = arith.constant dense<0.000000e+00> : vector<8x128xf32>
    %75 = tpu.matmul %55, %10, %cst_28 {dimension_numbers = #tpu.dot_dimension_numbers<[1], [0], [0], [1], [0, 0, 1, 1], [], []>} : vector<8x32xf32>, vector<32x128xf32>, vector<8x128xf32> -> vector<8x128xf32>
    %76 = arith.addf %74, %75 : vector<8x128xf32>
    %77 = arith.addf %76, %14 : vector<8x128xf32>
    %78 = arith.negf %77 : vector<8x128xf32>
    %79 = math.exp %78 : vector<8x128xf32>
    %cst_29 = arith.constant 1.000000e+00 : f32
    %80 = vector.broadcast %cst_29 : f32 to vector<8x128xf32>
    %81 = arith.addf %80, %79 : vector<8x128xf32>
    %82 = arith.divf %80, %81 : vector<8x128xf32>
    %83 = math.tanh %77 : vector<8x128xf32>
    %84 = vector.extract_strided_slice %82 {offsets = [0, 0], sizes = [8, 32], strides = [1, 1]} : vector<8x128xf32> to vector<8x32xf32>
    %85 = vector.extract_strided_slice %82 {offsets = [0, 32], sizes = [8, 32], strides = [1, 1]} : vector<8x128xf32> to vector<8x32xf32>
    %86 = vector.extract_strided_slice %83 {offsets = [0, 64], sizes = [8, 32], strides = [1, 1]} : vector<8x128xf32> to vector<8x32xf32>
    %87 = vector.extract_strided_slice %82 {offsets = [0, 96], sizes = [8, 32], strides = [1, 1]} : vector<8x128xf32> to vector<8x32xf32>
    %88 = arith.mulf %85, %53 : vector<8x32xf32>
    %89 = arith.mulf %84, %86 : vector<8x32xf32>
    %90 = arith.addf %88, %89 : vector<8x32xf32>
    %91 = math.tanh %90 : vector<8x32xf32>
    %92 = arith.mulf %87, %91 : vector<8x32xf32>
    %93 = vector.extract_strided_slice %5 {offsets = [16, 0], sizes = [8, 128], strides = [1, 1]} : vector<64x128xf32> to vector<8x128xf32>
    %cst_30 = arith.constant dense<0.000000e+00> : vector<8x128xf32>
    %94 = tpu.matmul %73, %6, %cst_30 {dimension_numbers = #tpu.dot_dimension_numbers<[1], [0], [0], [1], [0, 0, 1, 1], [], []>} : vector<8x32xf32>, vector<32x128xf32>, vector<8x128xf32> -> vector<8x128xf32>
    %95 = arith.addf %93, %94 : vector<8x128xf32>
    %96 = arith.negf %95 : vector<8x128xf32>
    %97 = math.exp %96 : vector<8x128xf32>
    %cst_31 = arith.constant 1.000000e+00 : f32
    %98 = vector.broadcast %cst_31 : f32 to vector<8x128xf32>
    %99 = arith.addf %98, %97 : vector<8x128xf32>
    %100 = arith.divf %98, %99 : vector<8x128xf32>
    %101 = math.tanh %95 : vector<8x128xf32>
    %102 = vector.extract_strided_slice %100 {offsets = [0, 0], sizes = [8, 32], strides = [1, 1]} : vector<8x128xf32> to vector<8x32xf32>
    %103 = vector.extract_strided_slice %100 {offsets = [0, 32], sizes = [8, 32], strides = [1, 1]} : vector<8x128xf32> to vector<8x32xf32>
    %104 = vector.extract_strided_slice %101 {offsets = [0, 64], sizes = [8, 32], strides = [1, 1]} : vector<8x128xf32> to vector<8x32xf32>
    %105 = vector.extract_strided_slice %100 {offsets = [0, 96], sizes = [8, 32], strides = [1, 1]} : vector<8x128xf32> to vector<8x32xf32>
    %106 = arith.mulf %103, %71 : vector<8x32xf32>
    %107 = arith.mulf %102, %104 : vector<8x32xf32>
    %108 = arith.addf %106, %107 : vector<8x32xf32>
    %109 = math.tanh %108 : vector<8x32xf32>
    %110 = arith.mulf %105, %109 : vector<8x32xf32>
    %cst_32 = arith.constant dense<0.000000e+00> : vector<8x128xf32>
    %111 = tpu.matmul %110, %8, %cst_32 {dimension_numbers = #tpu.dot_dimension_numbers<[1], [0], [0], [1], [0, 0, 1, 1], [], []>} : vector<8x32xf32>, vector<32x128xf32>, vector<8x128xf32> -> vector<8x128xf32>
    %cst_33 = arith.constant dense<0.000000e+00> : vector<8x128xf32>
    %112 = tpu.matmul %92, %10, %cst_33 {dimension_numbers = #tpu.dot_dimension_numbers<[1], [0], [0], [1], [0, 0, 1, 1], [], []>} : vector<8x32xf32>, vector<32x128xf32>, vector<8x128xf32> -> vector<8x128xf32>
    %113 = arith.addf %111, %112 : vector<8x128xf32>
    %114 = arith.addf %113, %14 : vector<8x128xf32>
    %115 = arith.negf %114 : vector<8x128xf32>
    %116 = math.exp %115 : vector<8x128xf32>
    %cst_34 = arith.constant 1.000000e+00 : f32
    %117 = vector.broadcast %cst_34 : f32 to vector<8x128xf32>
    %118 = arith.addf %117, %116 : vector<8x128xf32>
    %119 = arith.divf %117, %118 : vector<8x128xf32>
    %120 = math.tanh %114 : vector<8x128xf32>
    %121 = vector.extract_strided_slice %119 {offsets = [0, 0], sizes = [8, 32], strides = [1, 1]} : vector<8x128xf32> to vector<8x32xf32>
    %122 = vector.extract_strided_slice %119 {offsets = [0, 32], sizes = [8, 32], strides = [1, 1]} : vector<8x128xf32> to vector<8x32xf32>
    %123 = vector.extract_strided_slice %120 {offsets = [0, 64], sizes = [8, 32], strides = [1, 1]} : vector<8x128xf32> to vector<8x32xf32>
    %124 = vector.extract_strided_slice %119 {offsets = [0, 96], sizes = [8, 32], strides = [1, 1]} : vector<8x128xf32> to vector<8x32xf32>
    %125 = arith.mulf %122, %90 : vector<8x32xf32>
    %126 = arith.mulf %121, %123 : vector<8x32xf32>
    %127 = arith.addf %125, %126 : vector<8x32xf32>
    %128 = math.tanh %127 : vector<8x32xf32>
    %129 = arith.mulf %124, %128 : vector<8x32xf32>
    %130 = vector.extract_strided_slice %5 {offsets = [24, 0], sizes = [8, 128], strides = [1, 1]} : vector<64x128xf32> to vector<8x128xf32>
    %cst_35 = arith.constant dense<0.000000e+00> : vector<8x128xf32>
    %131 = tpu.matmul %110, %6, %cst_35 {dimension_numbers = #tpu.dot_dimension_numbers<[1], [0], [0], [1], [0, 0, 1, 1], [], []>} : vector<8x32xf32>, vector<32x128xf32>, vector<8x128xf32> -> vector<8x128xf32>
    %132 = arith.addf %130, %131 : vector<8x128xf32>
    %133 = arith.negf %132 : vector<8x128xf32>
    %134 = math.exp %133 : vector<8x128xf32>
    %cst_36 = arith.constant 1.000000e+00 : f32
    %135 = vector.broadcast %cst_36 : f32 to vector<8x128xf32>
    %136 = arith.addf %135, %134 : vector<8x128xf32>
    %137 = arith.divf %135, %136 : vector<8x128xf32>
    %138 = math.tanh %132 : vector<8x128xf32>
    %139 = vector.extract_strided_slice %137 {offsets = [0, 0], sizes = [8, 32], strides = [1, 1]} : vector<8x128xf32> to vector<8x32xf32>
    %140 = vector.extract_strided_slice %137 {offsets = [0, 32], sizes = [8, 32], strides = [1, 1]} : vector<8x128xf32> to vector<8x32xf32>
    %141 = vector.extract_strided_slice %138 {offsets = [0, 64], sizes = [8, 32], strides = [1, 1]} : vector<8x128xf32> to vector<8x32xf32>
    %142 = vector.extract_strided_slice %137 {offsets = [0, 96], sizes = [8, 32], strides = [1, 1]} : vector<8x128xf32> to vector<8x32xf32>
    %143 = arith.mulf %140, %108 : vector<8x32xf32>
    %144 = arith.mulf %139, %141 : vector<8x32xf32>
    %145 = arith.addf %143, %144 : vector<8x32xf32>
    %146 = math.tanh %145 : vector<8x32xf32>
    %147 = arith.mulf %142, %146 : vector<8x32xf32>
    %cst_37 = arith.constant dense<0.000000e+00> : vector<8x128xf32>
    %148 = tpu.matmul %147, %8, %cst_37 {dimension_numbers = #tpu.dot_dimension_numbers<[1], [0], [0], [1], [0, 0, 1, 1], [], []>} : vector<8x32xf32>, vector<32x128xf32>, vector<8x128xf32> -> vector<8x128xf32>
    %cst_38 = arith.constant dense<0.000000e+00> : vector<8x128xf32>
    %149 = tpu.matmul %129, %10, %cst_38 {dimension_numbers = #tpu.dot_dimension_numbers<[1], [0], [0], [1], [0, 0, 1, 1], [], []>} : vector<8x32xf32>, vector<32x128xf32>, vector<8x128xf32> -> vector<8x128xf32>
    %150 = arith.addf %148, %149 : vector<8x128xf32>
    %151 = arith.addf %150, %14 : vector<8x128xf32>
    %152 = arith.negf %151 : vector<8x128xf32>
    %153 = math.exp %152 : vector<8x128xf32>
    %cst_39 = arith.constant 1.000000e+00 : f32
    %154 = vector.broadcast %cst_39 : f32 to vector<8x128xf32>
    %155 = arith.addf %154, %153 : vector<8x128xf32>
    %156 = arith.divf %154, %155 : vector<8x128xf32>
    %157 = math.tanh %151 : vector<8x128xf32>
    %158 = vector.extract_strided_slice %156 {offsets = [0, 0], sizes = [8, 32], strides = [1, 1]} : vector<8x128xf32> to vector<8x32xf32>
    %159 = vector.extract_strided_slice %156 {offsets = [0, 32], sizes = [8, 32], strides = [1, 1]} : vector<8x128xf32> to vector<8x32xf32>
    %160 = vector.extract_strided_slice %157 {offsets = [0, 64], sizes = [8, 32], strides = [1, 1]} : vector<8x128xf32> to vector<8x32xf32>
    %161 = vector.extract_strided_slice %156 {offsets = [0, 96], sizes = [8, 32], strides = [1, 1]} : vector<8x128xf32> to vector<8x32xf32>
    %162 = arith.mulf %159, %127 : vector<8x32xf32>
    %163 = arith.mulf %158, %160 : vector<8x32xf32>
    %164 = arith.addf %162, %163 : vector<8x32xf32>
    %165 = math.tanh %164 : vector<8x32xf32>
    %166 = arith.mulf %161, %165 : vector<8x32xf32>
    %167 = vector.extract_strided_slice %5 {offsets = [32, 0], sizes = [8, 128], strides = [1, 1]} : vector<64x128xf32> to vector<8x128xf32>
    %cst_40 = arith.constant dense<0.000000e+00> : vector<8x128xf32>
    %168 = tpu.matmul %147, %6, %cst_40 {dimension_numbers = #tpu.dot_dimension_numbers<[1], [0], [0], [1], [0, 0, 1, 1], [], []>} : vector<8x32xf32>, vector<32x128xf32>, vector<8x128xf32> -> vector<8x128xf32>
    %169 = arith.addf %167, %168 : vector<8x128xf32>
    %170 = arith.negf %169 : vector<8x128xf32>
    %171 = math.exp %170 : vector<8x128xf32>
    %cst_41 = arith.constant 1.000000e+00 : f32
    %172 = vector.broadcast %cst_41 : f32 to vector<8x128xf32>
    %173 = arith.addf %172, %171 : vector<8x128xf32>
    %174 = arith.divf %172, %173 : vector<8x128xf32>
    %175 = math.tanh %169 : vector<8x128xf32>
    %176 = vector.extract_strided_slice %174 {offsets = [0, 0], sizes = [8, 32], strides = [1, 1]} : vector<8x128xf32> to vector<8x32xf32>
    %177 = vector.extract_strided_slice %174 {offsets = [0, 32], sizes = [8, 32], strides = [1, 1]} : vector<8x128xf32> to vector<8x32xf32>
    %178 = vector.extract_strided_slice %175 {offsets = [0, 64], sizes = [8, 32], strides = [1, 1]} : vector<8x128xf32> to vector<8x32xf32>
    %179 = vector.extract_strided_slice %174 {offsets = [0, 96], sizes = [8, 32], strides = [1, 1]} : vector<8x128xf32> to vector<8x32xf32>
    %180 = arith.mulf %177, %145 : vector<8x32xf32>
    %181 = arith.mulf %176, %178 : vector<8x32xf32>
    %182 = arith.addf %180, %181 : vector<8x32xf32>
    %183 = math.tanh %182 : vector<8x32xf32>
    %184 = arith.mulf %179, %183 : vector<8x32xf32>
    %cst_42 = arith.constant dense<0.000000e+00> : vector<8x128xf32>
    %185 = tpu.matmul %184, %8, %cst_42 {dimension_numbers = #tpu.dot_dimension_numbers<[1], [0], [0], [1], [0, 0, 1, 1], [], []>} : vector<8x32xf32>, vector<32x128xf32>, vector<8x128xf32> -> vector<8x128xf32>
    %cst_43 = arith.constant dense<0.000000e+00> : vector<8x128xf32>
    %186 = tpu.matmul %166, %10, %cst_43 {dimension_numbers = #tpu.dot_dimension_numbers<[1], [0], [0], [1], [0, 0, 1, 1], [], []>} : vector<8x32xf32>, vector<32x128xf32>, vector<8x128xf32> -> vector<8x128xf32>
    %187 = arith.addf %185, %186 : vector<8x128xf32>
    %188 = arith.addf %187, %14 : vector<8x128xf32>
    %189 = arith.negf %188 : vector<8x128xf32>
    %190 = math.exp %189 : vector<8x128xf32>
    %cst_44 = arith.constant 1.000000e+00 : f32
    %191 = vector.broadcast %cst_44 : f32 to vector<8x128xf32>
    %192 = arith.addf %191, %190 : vector<8x128xf32>
    %193 = arith.divf %191, %192 : vector<8x128xf32>
    %194 = math.tanh %188 : vector<8x128xf32>
    %195 = vector.extract_strided_slice %193 {offsets = [0, 0], sizes = [8, 32], strides = [1, 1]} : vector<8x128xf32> to vector<8x32xf32>
    %196 = vector.extract_strided_slice %193 {offsets = [0, 32], sizes = [8, 32], strides = [1, 1]} : vector<8x128xf32> to vector<8x32xf32>
    %197 = vector.extract_strided_slice %194 {offsets = [0, 64], sizes = [8, 32], strides = [1, 1]} : vector<8x128xf32> to vector<8x32xf32>
    %198 = vector.extract_strided_slice %193 {offsets = [0, 96], sizes = [8, 32], strides = [1, 1]} : vector<8x128xf32> to vector<8x32xf32>
    %199 = arith.mulf %196, %164 : vector<8x32xf32>
    %200 = arith.mulf %195, %197 : vector<8x32xf32>
    %201 = arith.addf %199, %200 : vector<8x32xf32>
    %202 = math.tanh %201 : vector<8x32xf32>
    %203 = arith.mulf %198, %202 : vector<8x32xf32>
    %204 = vector.extract_strided_slice %5 {offsets = [40, 0], sizes = [8, 128], strides = [1, 1]} : vector<64x128xf32> to vector<8x128xf32>
    %cst_45 = arith.constant dense<0.000000e+00> : vector<8x128xf32>
    %205 = tpu.matmul %184, %6, %cst_45 {dimension_numbers = #tpu.dot_dimension_numbers<[1], [0], [0], [1], [0, 0, 1, 1], [], []>} : vector<8x32xf32>, vector<32x128xf32>, vector<8x128xf32> -> vector<8x128xf32>
    %206 = arith.addf %204, %205 : vector<8x128xf32>
    %207 = arith.negf %206 : vector<8x128xf32>
    %208 = math.exp %207 : vector<8x128xf32>
    %cst_46 = arith.constant 1.000000e+00 : f32
    %209 = vector.broadcast %cst_46 : f32 to vector<8x128xf32>
    %210 = arith.addf %209, %208 : vector<8x128xf32>
    %211 = arith.divf %209, %210 : vector<8x128xf32>
    %212 = math.tanh %206 : vector<8x128xf32>
    %213 = vector.extract_strided_slice %211 {offsets = [0, 0], sizes = [8, 32], strides = [1, 1]} : vector<8x128xf32> to vector<8x32xf32>
    %214 = vector.extract_strided_slice %211 {offsets = [0, 32], sizes = [8, 32], strides = [1, 1]} : vector<8x128xf32> to vector<8x32xf32>
    %215 = vector.extract_strided_slice %212 {offsets = [0, 64], sizes = [8, 32], strides = [1, 1]} : vector<8x128xf32> to vector<8x32xf32>
    %216 = vector.extract_strided_slice %211 {offsets = [0, 96], sizes = [8, 32], strides = [1, 1]} : vector<8x128xf32> to vector<8x32xf32>
    %217 = arith.mulf %214, %182 : vector<8x32xf32>
    %218 = arith.mulf %213, %215 : vector<8x32xf32>
    %219 = arith.addf %217, %218 : vector<8x32xf32>
    %220 = math.tanh %219 : vector<8x32xf32>
    %221 = arith.mulf %216, %220 : vector<8x32xf32>
    %cst_47 = arith.constant dense<0.000000e+00> : vector<8x128xf32>
    %222 = tpu.matmul %221, %8, %cst_47 {dimension_numbers = #tpu.dot_dimension_numbers<[1], [0], [0], [1], [0, 0, 1, 1], [], []>} : vector<8x32xf32>, vector<32x128xf32>, vector<8x128xf32> -> vector<8x128xf32>
    %cst_48 = arith.constant dense<0.000000e+00> : vector<8x128xf32>
    %223 = tpu.matmul %203, %10, %cst_48 {dimension_numbers = #tpu.dot_dimension_numbers<[1], [0], [0], [1], [0, 0, 1, 1], [], []>} : vector<8x32xf32>, vector<32x128xf32>, vector<8x128xf32> -> vector<8x128xf32>
    %224 = arith.addf %222, %223 : vector<8x128xf32>
    %225 = arith.addf %224, %14 : vector<8x128xf32>
    %226 = arith.negf %225 : vector<8x128xf32>
    %227 = math.exp %226 : vector<8x128xf32>
    %cst_49 = arith.constant 1.000000e+00 : f32
    %228 = vector.broadcast %cst_49 : f32 to vector<8x128xf32>
    %229 = arith.addf %228, %227 : vector<8x128xf32>
    %230 = arith.divf %228, %229 : vector<8x128xf32>
    %231 = math.tanh %225 : vector<8x128xf32>
    %232 = vector.extract_strided_slice %230 {offsets = [0, 0], sizes = [8, 32], strides = [1, 1]} : vector<8x128xf32> to vector<8x32xf32>
    %233 = vector.extract_strided_slice %230 {offsets = [0, 32], sizes = [8, 32], strides = [1, 1]} : vector<8x128xf32> to vector<8x32xf32>
    %234 = vector.extract_strided_slice %231 {offsets = [0, 64], sizes = [8, 32], strides = [1, 1]} : vector<8x128xf32> to vector<8x32xf32>
    %235 = vector.extract_strided_slice %230 {offsets = [0, 96], sizes = [8, 32], strides = [1, 1]} : vector<8x128xf32> to vector<8x32xf32>
    %236 = arith.mulf %233, %201 : vector<8x32xf32>
    %237 = arith.mulf %232, %234 : vector<8x32xf32>
    %238 = arith.addf %236, %237 : vector<8x32xf32>
    %239 = math.tanh %238 : vector<8x32xf32>
    %240 = arith.mulf %235, %239 : vector<8x32xf32>
    %241 = vector.extract_strided_slice %5 {offsets = [48, 0], sizes = [8, 128], strides = [1, 1]} : vector<64x128xf32> to vector<8x128xf32>
    %cst_50 = arith.constant dense<0.000000e+00> : vector<8x128xf32>
    %242 = tpu.matmul %221, %6, %cst_50 {dimension_numbers = #tpu.dot_dimension_numbers<[1], [0], [0], [1], [0, 0, 1, 1], [], []>} : vector<8x32xf32>, vector<32x128xf32>, vector<8x128xf32> -> vector<8x128xf32>
    %243 = arith.addf %241, %242 : vector<8x128xf32>
    %244 = arith.negf %243 : vector<8x128xf32>
    %245 = math.exp %244 : vector<8x128xf32>
    %cst_51 = arith.constant 1.000000e+00 : f32
    %246 = vector.broadcast %cst_51 : f32 to vector<8x128xf32>
    %247 = arith.addf %246, %245 : vector<8x128xf32>
    %248 = arith.divf %246, %247 : vector<8x128xf32>
    %249 = math.tanh %243 : vector<8x128xf32>
    %250 = vector.extract_strided_slice %248 {offsets = [0, 0], sizes = [8, 32], strides = [1, 1]} : vector<8x128xf32> to vector<8x32xf32>
    %251 = vector.extract_strided_slice %248 {offsets = [0, 32], sizes = [8, 32], strides = [1, 1]} : vector<8x128xf32> to vector<8x32xf32>
    %252 = vector.extract_strided_slice %249 {offsets = [0, 64], sizes = [8, 32], strides = [1, 1]} : vector<8x128xf32> to vector<8x32xf32>
    %253 = vector.extract_strided_slice %248 {offsets = [0, 96], sizes = [8, 32], strides = [1, 1]} : vector<8x128xf32> to vector<8x32xf32>
    %254 = arith.mulf %251, %219 : vector<8x32xf32>
    %255 = arith.mulf %250, %252 : vector<8x32xf32>
    %256 = arith.addf %254, %255 : vector<8x32xf32>
    %257 = math.tanh %256 : vector<8x32xf32>
    %258 = arith.mulf %253, %257 : vector<8x32xf32>
    %cst_52 = arith.constant dense<0.000000e+00> : vector<8x128xf32>
    %259 = tpu.matmul %258, %8, %cst_52 {dimension_numbers = #tpu.dot_dimension_numbers<[1], [0], [0], [1], [0, 0, 1, 1], [], []>} : vector<8x32xf32>, vector<32x128xf32>, vector<8x128xf32> -> vector<8x128xf32>
    %cst_53 = arith.constant dense<0.000000e+00> : vector<8x128xf32>
    %260 = tpu.matmul %240, %10, %cst_53 {dimension_numbers = #tpu.dot_dimension_numbers<[1], [0], [0], [1], [0, 0, 1, 1], [], []>} : vector<8x32xf32>, vector<32x128xf32>, vector<8x128xf32> -> vector<8x128xf32>
    %261 = arith.addf %259, %260 : vector<8x128xf32>
    %262 = arith.addf %261, %14 : vector<8x128xf32>
    %263 = arith.negf %262 : vector<8x128xf32>
    %264 = math.exp %263 : vector<8x128xf32>
    %cst_54 = arith.constant 1.000000e+00 : f32
    %265 = vector.broadcast %cst_54 : f32 to vector<8x128xf32>
    %266 = arith.addf %265, %264 : vector<8x128xf32>
    %267 = arith.divf %265, %266 : vector<8x128xf32>
    %268 = math.tanh %262 : vector<8x128xf32>
    %269 = vector.extract_strided_slice %267 {offsets = [0, 0], sizes = [8, 32], strides = [1, 1]} : vector<8x128xf32> to vector<8x32xf32>
    %270 = vector.extract_strided_slice %267 {offsets = [0, 32], sizes = [8, 32], strides = [1, 1]} : vector<8x128xf32> to vector<8x32xf32>
    %271 = vector.extract_strided_slice %268 {offsets = [0, 64], sizes = [8, 32], strides = [1, 1]} : vector<8x128xf32> to vector<8x32xf32>
    %272 = vector.extract_strided_slice %267 {offsets = [0, 96], sizes = [8, 32], strides = [1, 1]} : vector<8x128xf32> to vector<8x32xf32>
    %273 = arith.mulf %270, %238 : vector<8x32xf32>
    %274 = arith.mulf %269, %271 : vector<8x32xf32>
    %275 = arith.addf %273, %274 : vector<8x32xf32>
    %276 = math.tanh %275 : vector<8x32xf32>
    %277 = arith.mulf %272, %276 : vector<8x32xf32>
    %278 = vector.extract_strided_slice %5 {offsets = [56, 0], sizes = [8, 128], strides = [1, 1]} : vector<64x128xf32> to vector<8x128xf32>
    %cst_55 = arith.constant dense<0.000000e+00> : vector<8x128xf32>
    %279 = tpu.matmul %258, %6, %cst_55 {dimension_numbers = #tpu.dot_dimension_numbers<[1], [0], [0], [1], [0, 0, 1, 1], [], []>} : vector<8x32xf32>, vector<32x128xf32>, vector<8x128xf32> -> vector<8x128xf32>
    %280 = arith.addf %278, %279 : vector<8x128xf32>
    %281 = arith.negf %280 : vector<8x128xf32>
    %282 = math.exp %281 : vector<8x128xf32>
    %cst_56 = arith.constant 1.000000e+00 : f32
    %283 = vector.broadcast %cst_56 : f32 to vector<8x128xf32>
    %284 = arith.addf %283, %282 : vector<8x128xf32>
    %285 = arith.divf %283, %284 : vector<8x128xf32>
    %286 = math.tanh %280 : vector<8x128xf32>
    %287 = vector.extract_strided_slice %285 {offsets = [0, 0], sizes = [8, 32], strides = [1, 1]} : vector<8x128xf32> to vector<8x32xf32>
    %288 = vector.extract_strided_slice %285 {offsets = [0, 32], sizes = [8, 32], strides = [1, 1]} : vector<8x128xf32> to vector<8x32xf32>
    %289 = vector.extract_strided_slice %286 {offsets = [0, 64], sizes = [8, 32], strides = [1, 1]} : vector<8x128xf32> to vector<8x32xf32>
    %290 = vector.extract_strided_slice %285 {offsets = [0, 96], sizes = [8, 32], strides = [1, 1]} : vector<8x128xf32> to vector<8x32xf32>
    %291 = arith.mulf %288, %256 : vector<8x32xf32>
    %292 = arith.mulf %287, %289 : vector<8x32xf32>
    %293 = arith.addf %291, %292 : vector<8x32xf32>
    %294 = math.tanh %293 : vector<8x32xf32>
    %295 = arith.mulf %290, %294 : vector<8x32xf32>
    %cst_57 = arith.constant dense<0.000000e+00> : vector<8x128xf32>
    %296 = tpu.matmul %295, %8, %cst_57 {dimension_numbers = #tpu.dot_dimension_numbers<[1], [0], [0], [1], [0, 0, 1, 1], [], []>} : vector<8x32xf32>, vector<32x128xf32>, vector<8x128xf32> -> vector<8x128xf32>
    %cst_58 = arith.constant dense<0.000000e+00> : vector<8x128xf32>
    %297 = tpu.matmul %277, %10, %cst_58 {dimension_numbers = #tpu.dot_dimension_numbers<[1], [0], [0], [1], [0, 0, 1, 1], [], []>} : vector<8x32xf32>, vector<32x128xf32>, vector<8x128xf32> -> vector<8x128xf32>
    %298 = arith.addf %296, %297 : vector<8x128xf32>
    %299 = arith.addf %298, %14 : vector<8x128xf32>
    %300 = arith.negf %299 : vector<8x128xf32>
    %301 = math.exp %300 : vector<8x128xf32>
    %cst_59 = arith.constant 1.000000e+00 : f32
    %302 = vector.broadcast %cst_59 : f32 to vector<8x128xf32>
    %303 = arith.addf %302, %301 : vector<8x128xf32>
    %304 = arith.divf %302, %303 : vector<8x128xf32>
    %305 = math.tanh %299 : vector<8x128xf32>
    %306 = vector.extract_strided_slice %304 {offsets = [0, 0], sizes = [8, 32], strides = [1, 1]} : vector<8x128xf32> to vector<8x32xf32>
    %307 = vector.extract_strided_slice %304 {offsets = [0, 32], sizes = [8, 32], strides = [1, 1]} : vector<8x128xf32> to vector<8x32xf32>
    %308 = vector.extract_strided_slice %305 {offsets = [0, 64], sizes = [8, 32], strides = [1, 1]} : vector<8x128xf32> to vector<8x32xf32>
    %309 = vector.extract_strided_slice %304 {offsets = [0, 96], sizes = [8, 32], strides = [1, 1]} : vector<8x128xf32> to vector<8x32xf32>
    %310 = arith.mulf %307, %275 : vector<8x32xf32>
    %311 = arith.mulf %306, %308 : vector<8x32xf32>
    %312 = arith.addf %310, %311 : vector<8x32xf32>
    %313 = math.tanh %312 : vector<8x32xf32>
    %314 = arith.mulf %309, %313 : vector<8x32xf32>
    %c0_60 = arith.constant 0 : index
    %c0_61 = arith.constant 0 : index
    %315 = vector.load %arg7[%c0_60, %c0_61] : memref<32x128xf32, #tpu.memory_space<vmem>>, vector<32x128xf32>
    %cst_62 = arith.constant dense<0.000000e+00> : vector<8x128xf32>
    %316 = tpu.matmul %314, %315, %cst_62 {dimension_numbers = #tpu.dot_dimension_numbers<[1], [0], [0], [1], [0, 0, 1, 1], [], []>} : vector<8x32xf32>, vector<32x128xf32>, vector<8x128xf32> -> vector<8x128xf32>
    %c0_63 = arith.constant 0 : index
    %c0_64 = arith.constant 0 : index
    %317 = vector.load %arg8[%c0_63, %c0_64] : memref<1x128xf32, #tpu.memory_space<vmem>>, vector<1x128xf32>
    %318 = vector.broadcast %317 : vector<1x128xf32> to vector<8x128xf32>
    %319 = arith.addf %316, %318 : vector<8x128xf32>
    %c0_65 = arith.constant 0 : index
    %c0_66 = arith.constant 0 : index
    %320 = vector.load %arg9[%c0_65, %c0_66] : memref<8x128xf32, #tpu.memory_space<vmem>>, vector<8x128xf32>
    tpu.vector_store %arg9[%c0_65, %c0_66], %319 {strides = array<i32>} : memref<8x128xf32, #tpu.memory_space<vmem>>, vector<8x128xf32>,
    return
  }
}

</mosaic_0001>

<bundles_post_ra>
// kernel: tpu_custom_call.1
= control target key start
LH: loop header
LB: loop body
LE: loop exit
PB: predicated region body
PF: predicated region fallthrough
CT: control target
= control target key end

     0   :  { %14 = vsyncpa [#allocation3], 0  ;;  %s2076_s0 = inlined_call_operand.vmem [shape: f32[64,4], index: 0, kind: input, shape index: {}]   ;;  %s2077_s1 = inlined_call_operand.vmem [shape: f32[4,128], index: 1, kind: input, shape index: {}]   ;;  %s2078_s2 = inlined_call_operand.vmem [shape: f32[1,128], index: 2, kind: input, shape index: {}]   ;;  %s2079_s3 = inlined_call_operand.vmem [shape: f32[32,128], index: 3, kind: input, shape index: {}]   ;;  %s2080_s4 = inlined_call_operand.vmem [shape: f32[1,32,128], index: 4, kind: input, shape index: {}]   ;;  %s2081_s5 = inlined_call_operand.hbm [shape: f32[1,32,128], index: 5, kind: input, shape index: {}]   ;;  %s2082_s6 = inlined_call_operand.vmem [shape: f32[1,1,128], index: 6, kind: input, shape index: {}]   ;;  %s2083_s7 = inlined_call_operand.hbm [shape: f32[32,128], index: 7, kind: input, shape index: {}]   ;;  %s2084_s8 = inlined_call_operand.vmem [shape: f32[1,128], index: 8, kind: input, shape index: {}]   ;;  %s2085_s9 = inlined_call_operand.hbm [shape: f32[8,128], index: 9, kind: output, shape index: {}]  }
   0x1   :  { %15 = vsyncpa [#allocation6], 0 }
   0x2   :  { %16 = vsyncpa [#allocation4], 0  ;;  %s31_s11 = sshll.u32 %s2081_s5, 4  ;;  %s1652_s12 = smov [#allocation2]   ;;  %s32_s11 = int_to_ptr.hbm [resolvable:$true] %s31_s11 }
   0x3   :  { %s33_s13 = sshll.u32 %s1652_s12, 4  ;;  %s46_s16 = sshll.u32 %s2083_s7, 4  ;;  %s34_s13 = int_to_ptr.vmem [resolvable:$true] %s33_s13  ;;  %s47_s16 = int_to_ptr.hbm [resolvable:$true] %s46_s16 }
   0x4   :  { %s1653_s17 = smov 128   ;;  %s1654_s18 = smov 8  }
   0x5   :  { %39 = dma.hbm_to_vmem [thread:$0]  %s32_s11, 512, %s34_s13, [#allocation3], %s1653_s17, %s1653_s17, %s1654_s18  }
   0x6   :  { %s1655_s19 = smov [#allocation5]  }
   0x7   :  { %s48_s20 = sshll.u32 %s1655_s19, 4  ;;  %s49_s20 = int_to_ptr.vmem [resolvable:$true] %s48_s20 }
   0x8   :  { %54 = dma.hbm_to_vmem [thread:$0]  %s47_s16, 512, %s49_s20, [#allocation6], %s1653_s17, %s1653_s17, %s1654_s18  }
   0x9   :  { %1646 = dma.done.wait [#allocation3], 512  }
   0xa   :  { %1647 = vsyncadd [#allocation3], 4294966784 }
   0xb   :  { %1648 = dma.done.wait [#allocation6], 512  }
   0xc   :  { %1649 = vsyncadd [#allocation6], 4294966784  ;;  %vm103_vm0 = vcmask 1043456   ;;  %vm78_vm1 = vcmask 31744   ;;  %v1719_v0 = vld [vmem:[%s2079_s3 + $0x18] sm:$0xff]  ;;  %v1724_v1 = vld [vmem:[%s2079_s3 + $0x10] sm:$0xff] }
   0xd   :  { %v73_v2 = vld [vmem:[%s2077_s1] sm:$0xf]  ;;  %180 = vmatpush.msra.mxu1 %v1719_v0  ;;  %v1736_v4 = vld [vmem:[%s2079_s3 + $0x8] sm:$0xff]  ;;  %v1656_v6 = vmov 0.0   ;;  %s1657_s10 = smov 64   ;;  %s1658_s11 = smov 32  }
   0xe   :  { %1383 = vmatpush.msk.msra.mxu0 %vm103_vm0, %v73_v2  ;;  %v65_v3 = vld [vmem:[%s2076_s0] sm:$0xff]  ;;  %v1768_v32 = vld [vmem:[#allocation2 + $0x18] sm:$0xff]  ;;  %v1775_v34 = vld [vmem:[#allocation2 + $0x10] sm:$0xff]  ;;  %vm164_vm6 = vcmask 261120   ;;  %s1372_s18 = sshll.u32 %s2085_s9, 4  ;;  %s1373_s18 = int_to_ptr.hbm [resolvable:$true] %s1372_s18 }
   0xf   :  { %1384 = vmatmul.msk.f32.vlgmr.msra.gmra.mxu0 %vm78_vm1, %v65_v3  ;;  %181 = vmatpush.msra.mxu1 %v1724_v1  ;;  %v1743_v5 = vld [vmem:[%s2079_s3] sm:$0xff]  ;;  %v1773_v33 = vld [vmem:[%s2080_s4 + $0x18] sm:$0xff]  ;;  %v1782_v35 = vld [vmem:[%s2080_s4 + $0x10] sm:$0xff] }
  0x10   :  { %v1759_v7 = vld [vmem:[%s2078_s2] ss:$0 sm:$0xff]  ;;  %238 = vmatpush.msra.mxu2 %v1768_v32  ;;  %263 = vmatpush.msra.mxu3 %v1773_v33  ;;  %v1784_v36 = vld [vmem:[#allocation2 + $0x8] sm:$0xff] }
  0x11   :  { %182 = vmatpush.msra.mxu1 %v1736_v4  ;;  %v1789_v37 = vld [vmem:[%s2080_s4 + $0x8] sm:$0xff]  ;;  %v1797_v39 = vld [vmem:[#allocation2] sm:$0xff] }
  0x12   :  { %v66_v38 = vld [vmem:[%s2076_s0 + $0x8] sm:$0xff]  ;;  %239 = vmatpush.msra.mxu2 %v1775_v34  ;;  %264 = vmatpush.msra.mxu3 %v1782_v35  ;;  %v1802_v40 = vld [vmem:[%s2080_s4] sm:$0xff] }
  0x13   :  { %183 = vmatpush.msra.mxu1 %v1743_v5  ;;  %v1835_v45 = vld [vmem:[%s2082_s6] ss:$0 sm:$0xff] }
  0x14   :  { %184 = vmatmul.f32.vlgmr.msra.gmra.mxu1 %v1656_v6  ;;  %240 = vmatpush.msra.mxu2 %v1784_v36 }
  0x15   :  { %321 = vmatpush.msrb.mxu1 %v1719_v0  ;;  %265 = vmatpush.msra.mxu3 %v1789_v37 }
  0x16   :  { %241 = vmatpush.msra.mxu2 %v1797_v39 }
  0x17   :  { %322 = vmatpush.msrb.mxu1 %v1724_v1  ;;  %1385 = vmatmul.msk.f32.gmra.mxu0 %vm78_vm1, %v66_v38 }
  0x18   :  { %266 = vmatpush.msra.mxu3 %v1802_v40  ;;  %242 = vmatmul.f32.vlgmr.msra.gmra.mxu2 %v1656_v6 }
  0x19   :  { %323 = vmatpush.msrb.mxu1 %v1736_v4  ;;  %384 = vmatpush.msrb.mxu2 %v1768_v32 }
  0x1a   :  { %409 = vmatpush.msrb.mxu3 %v1773_v33 }
  0x1b   :  { %324 = vmatpush.msrb.mxu1 %v1743_v5  ;;  %385 = vmatpush.msrb.mxu2 %v1775_v34 }
  0x1c   :  { %410 = vmatpush.msrb.mxu3 %v1782_v35 }
  0x1d   :  { %467 = vmatpush.msra.mxu1 %v1719_v0  ;;  %386 = vmatpush.msrb.mxu2 %v1784_v36 }
  0x1e   :  { %411 = vmatpush.msrb.mxu3 %v1789_v37 }
  0x1f   :  { %468 = vmatpush.msra.mxu1 %v1724_v1  ;;  %387 = vmatpush.msrb.mxu2 %v1797_v39 }
  0x20   :  { %412 = vmatpush.msrb.mxu3 %v1802_v40 }
  0x21   :  { %469 = vmatpush.msra.mxu1 %v1736_v4  ;;  %530 = vmatpush.msra.mxu2 %v1768_v32 }
  0x23   :  { %470 = vmatpush.msra.mxu1 %v1743_v5  ;;  %531 = vmatpush.msra.mxu2 %v1775_v34 }
  0x25   :  { %532 = vmatpush.msra.mxu2 %v1784_v36 }
  0x27   :  { %533 = vmatpush.msra.mxu2 %v1797_v39 }
  0x8c   :  { %v124_v8 = vpop.f32.mrf.mxu0 }
  0x8d   :  { %v125_v9 = vadd.f32 %v1759_v7, %v124_v8 }
  0x91   :  { %v185_v10 = vpop.f32.mrf.mxu1 }
  0x92   :  { %v188_v11 = vadd.f32 %v185_v10, %v125_v9 }
  0x94   :  { %1442 = vtanh.f32 %v188_v11  ;;  %v1392_v13 = vmul.f32 -1.442695, %v188_v11  ;;  %v127_v48 = vpop.f32.mrf.mxu0 }
  0x95   :  { %v128_v50 = vadd.f32 %v1759_v7, %v127_v48 }
  0x96   :  { %1444 = vpow2.f32 %v1392_v13 }
  0x9a   :  { %v1443_v12 = vpop.eup %1442 }
  0x9b   :  { %211 = vrot.lane.b32.xlu0 %v1443_v12, %s1657_s10  ;;  %v243_v44 = vpop.f32.mrf.mxu2 }
  0x9c   :  { %v1445_v14 = vpop.eup %1444 }
  0x9d   :  { %v192_v15 = vadd.f32 1.0, %v1445_v14 }
  0x9f   :  { %1446 = vrcp.f32 %v192_v15  ;;  %v204_v21 = vand.u32 2147483648, %v192_v15  ;;  %vm198_vm3 = vweird.f32 %v192_v15  ;;  %v202_v22 = vand.u32 2147483647, %v192_v15 }
  0xa1   :  { %v205_v24 = vor.u32 1.1754944e-38, %v204_v21  ;;  %vm203_vm5 = vcmp.eq.f32.partialorder %v202_v22, 8.507059e+37 }
  0xa5   :  { %v1447_v16 = vpop.eup %1446 }
  0xa6   :  { %v194_v17 = vmul.f32 %v1447_v16, %v192_v15  ;;  %vm199_vm2 = vweird.f32 %v1447_v16 }
  0xa7   :  { %vm200_vm4 = vmor %vm198_vm3, %vm199_vm2 }
  0xa8   :  { %v195_v18 = vsub.f32 1.0, %v194_v17 }
  0xaa   :  { %v196_v19 = vmul.f32 %v1447_v16, %v195_v18 }
  0xac   :  { %v197_v20 = vadd.f32 %v1447_v16, %v196_v19 }
  0xae   :  { %v201_v23 = vsel %vm200_vm4, %v1447_v16, %v197_v20 }
  0xaf   :  { %v206_v26 = vsel %vm203_vm5, %v205_v24, %v201_v23 }
  0xb0   :  { %v209_v28 = vmul.f32 0.0, %v206_v26 }
 0x10d   :  { %v212_v25 = vpop.permute.xlu0 %211 }
 0x10e   :  { %v214_v27 = vmul.f32 %v212_v25, %v206_v26 }
 0x110   :  { %216 = vrot.lane.b32.xlu0 %v214_v27, %s1658_s11 }
 0x182   :  { %v217_v29 = vpop.permute.xlu0 %216 }
 0x183   :  { %v1764_v30 = vadd.f32 %v217_v29, %v209_v28 }
 0x185   :  { %1448 = vtanh.f32 %v1764_v30 }
 0x18b   :  { %v1449_v31 = vpop.eup %1448 }
 0x18c   :  { %222 = vrot.lane.b32.xlu1 %v1449_v31, %s1657_s10 }
 0x1fe   :  { %v223_v41 = vpop.permute.xlu1 %222 }
 0x1ff   :  { %v225_v42 = vmul.f32 %v223_v41, %v206_v26 }
 0x201   :  { %247 = vrot.lane.b32.xlu1 %v225_v42, %s1658_s11 }
 0x273   :  { %v248_v43 = vpop.permute.xlu1 %247 }
 0x274   :  { %1393 = vmatmul.msk.f32.vlgmr.msra.gmra.mxu3 %vm164_vm6, %v248_v43  ;;  %1395 = vmatmul.msk.f32.vlgmr.msrb.gmra.mxu1 %vm164_vm6, %v248_v43 }
 0x275   :  { %613 = vmatpush.msrb.mxu1 %v1719_v0  ;;  %555 = vmatpush.msra.mxu3 %v1773_v33 }
 0x277   :  { %614 = vmatpush.msrb.mxu1 %v1724_v1  ;;  %556 = vmatpush.msra.mxu3 %v1782_v35 }
 0x279   :  { %615 = vmatpush.msrb.mxu1 %v1736_v4  ;;  %557 = vmatpush.msra.mxu3 %v1789_v37 }
 0x27b   :  { %616 = vmatpush.msrb.mxu1 %v1743_v5  ;;  %558 = vmatpush.msra.mxu3 %v1802_v40 }
 0x2f1   :  { %v326_v51 = vpop.f32.mrf.mxu1 }
 0x2f2   :  { %v329_v52 = vadd.f32 %v326_v51, %v128_v50 }
 0x2f4   :  { %v1396_v56 = vmul.f32 -1.442695, %v329_v52 }
 0x2f7   :  { %v268_v46 = vpop.f32.mrf.mxu3 }
 0x2f8   :  { %v269_v47 = vadd.f32 %v268_v46, %v243_v44 }
 0x2fa   :  { %v271_v49 = vadd.f32 %v1835_v45, %v269_v47 }
 0x2fc   :  { %1450 = vtanh.f32 %v271_v49  ;;  %v1394_v55 = vmul.f32 -1.442695, %v271_v49 }
 0x2fd   :  { %1452 = vtanh.f32 %v329_v52 }
 0x2fe   :  { %1454 = vpow2.f32 %v1394_v55 }
 0x2ff   :  { %1456 = vpow2.f32 %v1396_v56 }
 0x302   :  { %v1451_v53 = vpop.eup %1450 }
 0x303   :  { %294 = vrot.lane.b32.xlu2 %v1451_v53, %s1657_s10  ;;  %v1453_v54 = vpop.eup %1452 }
 0x304   :  { %v1455_v57 = vpop.eup %1454 }
 0x305   :  { %v275_v58 = vadd.f32 1.0, %v1455_v57  ;;  %v1457_v59 = vpop.eup %1456 }
 0x306   :  { %v333_v60 = vadd.f32 1.0, %v1457_v59 }
 0x307   :  { %1458 = vrcp.f32 %v275_v58  ;;  %v287_v10 = vand.u32 2147483648, %v275_v58  ;;  %vm281_vm8 = vweird.f32 %v275_v58  ;;  %v285_v11 = vand.u32 2147483647, %v275_v58 }
 0x308   :  { %1460 = vrcp.f32 %v333_v60  ;;  %v345_v19 = vand.u32 2147483648, %v333_v60  ;;  %vm339_vm12 = vweird.f32 %v333_v60  ;;  %v343_v20 = vand.u32 2147483647, %v333_v60 }
 0x309   :  { %v288_v14 = vor.u32 1.1754944e-38, %v287_v10  ;;  %vm286_vm10 = vcmp.eq.f32.partialorder %v285_v11, 8.507059e+37 }
 0x30a   :  { %v346_v22 = vor.u32 1.1754944e-38, %v345_v19  ;;  %vm344_vm14 = vcmp.eq.f32.partialorder %v343_v20, 8.507059e+37 }
 0x30b   :  { %352 = vrot.lane.b32.xlu2 %v1453_v54, %s1657_s10 }
 0x30d   :  { %v1459_v61 = vpop.eup %1458 }
 0x30e   :  { %v277_v62 = vmul.f32 %v1459_v61, %v275_v58  ;;  %v1461_v2 = vpop.eup %1460  ;;  %vm282_vm7 = vweird.f32 %v1459_v61 }
 0x30f   :  { %v335_v6 = vmul.f32 %v1461_v2, %v333_v60  ;;  %vm283_vm9 = vmor %vm281_vm8, %vm282_vm7  ;;  %vm340_vm11 = vweird.f32 %v1461_v2 }
 0x310   :  { %v278_v63 = vsub.f32 1.0, %v277_v62  ;;  %vm341_vm13 = vmor %vm339_vm12, %vm340_vm11 }
 0x311   :  { %v336_v9 = vsub.f32 1.0, %v335_v6 }
 0x312   :  { %v279_v3 = vmul.f32 %v1459_v61, %v278_v63 }
 0x313   :  { %v337_v13 = vmul.f32 %v1461_v2, %v336_v9 }
 0x314   :  { %v280_v8 = vadd.f32 %v1459_v61, %v279_v3 }
 0x315   :  { %v338_v18 = vadd.f32 %v1461_v2, %v337_v13 }
 0x316   :  { %v284_v12 = vsel %vm283_vm9, %v1459_v61, %v280_v8 }
 0x317   :  { %v289_v16 = vsel %vm286_vm10, %v288_v14, %v284_v12  ;;  %v342_v21 = vsel %vm341_vm13, %v1461_v2, %v338_v18 }
 0x318   :  { %v347_v23 = vsel %vm344_vm14, %v346_v22, %v342_v21  ;;  %v292_v26 = vmul.f32 0.0, %v289_v16 }
 0x319   :  { %v350_v29 = vmul.f32 %v347_v23, %v1764_v30  ;;  %v67_v30 = vld [vmem:[%s2076_s0 + $0x10] sm:$0xff] }
 0x31a   :  { %1386 = vmatmul.msk.f32.gmra.mxu0 %vm78_vm1, %v67_v30 }
 0x35d   :  { %v295_v15 = vpop.permute.xlu2 %294 }
 0x35e   :  { %v297_v17 = vmul.f32 %v295_v15, %v289_v16 }
 0x360   :  { %299 = vrot.lane.b32.xlu0 %v297_v17, %s1658_s11 }
 0x365   :  { %v353_v24 = vpop.permute.xlu2 %352 }
 0x366   :  { %v355_v25 = vmul.f32 %v353_v24, %v347_v23 }
 0x368   :  { %357 = vrot.lane.b32.xlu1 %v355_v25, %s1658_s11 }
 0x397   :  { %v130_v50 = vpop.f32.mrf.mxu0 }
 0x398   :  { %v131_v51 = vadd.f32 %v1759_v7, %v130_v50 }
 0x3d2   :  { %v300_v27 = vpop.permute.xlu0 %299 }
 0x3d3   :  { %v1843_v28 = vadd.f32 %v300_v27, %v292_v26 }
 0x3d5   :  { %1462 = vtanh.f32 %v1843_v28 }
 0x3da   :  { %v358_v31 = vpop.permute.xlu1 %357 }
 0x3db   :  { %v1463_v38 = vpop.eup %1462  ;;  %v1847_v41 = vadd.f32 %v358_v31, %v350_v29 }
 0x3dc   :  { %305 = vrot.lane.b32.xlu2 %v1463_v38, %s1657_s10 }
 0x3dd   :  { %1464 = vtanh.f32 %v1847_v41 }
 0x3e3   :  { %v1465_v42 = vpop.eup %1464 }
 0x3e4   :  { %363 = vrot.lane.b32.xlu0 %v1465_v42, %s1657_s10 }
 0x436   :  { %v306_v43 = vpop.permute.xlu2 %305 }
 0x437   :  { %v308_v44 = vmul.f32 %v306_v43, %v289_v16 }
 0x439   :  { %368 = vrot.lane.b32.xlu1 %v308_v44, %s1658_s11 }
 0x456   :  { %v364_v46 = vpop.permute.xlu0 %363 }
 0x457   :  { %v366_v47 = vmul.f32 %v364_v46, %v347_v23 }
 0x459   :  { %393 = vrot.lane.b32.xlu2 %v366_v47, %s1658_s11 }
 0x4ab   :  { %v369_v48 = vpop.permute.xlu1 %368 }
 0x4ac   :  { %1397 = vmatmul.msk.f32.vlgmr.msrb.gmra.mxu2 %vm164_vm6, %v369_v48 }
 0x4ad   :  { %676 = vmatpush.msrb.mxu2 %v1768_v32 }
 0x4af   :  { %677 = vmatpush.msrb.mxu2 %v1775_v34 }
 0x4b1   :  { %678 = vmatpush.msrb.mxu2 %v1784_v36 }
 0x4b3   :  { %v394_v49 = vpop.permute.xlu2 %393  ;;  %679 = vmatpush.msrb.mxu2 %v1797_v39 }
 0x4b4   :  { %1398 = vmatmul.msk.f32.vlgmr.msrb.gmra.mxu3 %vm164_vm6, %v394_v49  ;;  %1400 = vmatmul.msk.f32.vlgmr.msra.gmra.mxu1 %vm164_vm6, %v394_v49 }
 0x4b5   :  { %701 = vmatpush.msrb.mxu3 %v1773_v33  ;;  %759 = vmatpush.msra.mxu1 %v1719_v0 }
 0x4b7   :  { %702 = vmatpush.msrb.mxu3 %v1782_v35  ;;  %760 = vmatpush.msra.mxu1 %v1724_v1 }
 0x4b9   :  { %703 = vmatpush.msrb.mxu3 %v1789_v37  ;;  %761 = vmatpush.msra.mxu1 %v1736_v4 }
 0x4bb   :  { %704 = vmatpush.msrb.mxu3 %v1802_v40  ;;  %762 = vmatpush.msra.mxu1 %v1743_v5 }
 0x52f   :  { %v389_v54 = vpop.f32.mrf.mxu2 }
 0x531   :  { %v472_v52 = vpop.f32.mrf.mxu1 }
 0x532   :  { %v475_v53 = vadd.f32 %v472_v52, %v131_v51 }
 0x534   :  { %1466 = vtanh.f32 %v475_v53  ;;  %v1401_v60 = vmul.f32 -1.442695, %v475_v53 }
 0x537   :  { %v414_v55 = vpop.f32.mrf.mxu3 }
 0x538   :  { %v415_v56 = vadd.f32 %v414_v55, %v389_v54 }
 0x53a   :  { %v1467_v57 = vpop.eup %1466  ;;  %v417_v58 = vadd.f32 %v1835_v45, %v415_v56 }
 0x53b   :  { %498 = vrot.lane.b32.xlu1 %v1467_v57, %s1657_s10 }
 0x53c   :  { %1468 = vtanh.f32 %v417_v58  ;;  %v1399_v61 = vmul.f32 -1.442695, %v417_v58 }
 0x53d   :  { %1470 = vpow2.f32 %v1401_v60 }
 0x53e   :  { %1472 = vpow2.f32 %v1399_v61 }
 0x542   :  { %v1469_v59 = vpop.eup %1468 }
 0x543   :  { %440 = vrot.lane.b32.xlu0 %v1469_v59, %s1657_s10  ;;  %v1471_v62 = vpop.eup %1470 }
 0x544   :  { %v479_v63 = vadd.f32 1.0, %v1471_v62  ;;  %v1473_v2 = vpop.eup %1472 }
 0x545   :  { %v421_v3 = vadd.f32 1.0, %v1473_v2 }
 0x546   :  { %1474 = vrcp.f32 %v479_v63  ;;  %v491_v15 = vand.u32 2147483648, %v479_v63  ;;  %vm485_vm0 = vweird.f32 %v479_v63  ;;  %v489_v16 = vand.u32 2147483647, %v479_v63 }
 0x547   :  { %1476 = vrcp.f32 %v421_v3  ;;  %v433_v24 = vand.u32 2147483648, %v421_v3  ;;  %vm427_vm5 = vweird.f32 %v421_v3  ;;  %v431_v25 = vand.u32 2147483647, %v421_v3 }
 0x548   :  { %v492_v19 = vor.u32 1.1754944e-38, %v491_v15  ;;  %vm490_vm3 = vcmp.eq.f32.partialorder %v489_v16, 8.507059e+37 }
 0x549   :  { %v434_v27 = vor.u32 1.1754944e-38, %v433_v24  ;;  %vm432_vm8 = vcmp.eq.f32.partialorder %v431_v25, 8.507059e+37 }
 0x54c   :  { %v1475_v6 = vpop.eup %1474 }
 0x54d   :  { %v481_v8 = vmul.f32 %v1475_v6, %v479_v63  ;;  %v1477_v10 = vpop.eup %1476  ;;  %vm486_vm15 = vweird.f32 %v1475_v6 }
 0x54e   :  { %v423_v12 = vmul.f32 %v1477_v10, %v421_v3  ;;  %vm487_vm2 = vmor %vm485_vm0, %vm486_vm15  ;;  %vm428_vm4 = vweird.f32 %v1477_v10 }
 0x54f   :  { %v482_v9 = vsub.f32 1.0, %v481_v8  ;;  %vm429_vm7 = vmor %vm427_vm5, %vm428_vm4 }
 0x550   :  { %v424_v14 = vsub.f32 1.0, %v423_v12 }
 0x551   :  { %v483_v11 = vmul.f32 %v1475_v6, %v482_v9 }
 0x552   :  { %v425_v18 = vmul.f32 %v1477_v10, %v424_v14 }
 0x553   :  { %v484_v13 = vadd.f32 %v1475_v6, %v483_v11 }
 0x554   :  { %v426_v23 = vadd.f32 %v1477_v10, %v425_v18 }
 0x555   :  { %v488_v17 = vsel %vm487_vm2, %v1475_v6, %v484_v13 }
 0x556   :  { %v493_v21 = vsel %vm490_vm3, %v492_v19, %v488_v17  ;;  %v430_v26 = vsel %vm429_vm7, %v1477_v10, %v426_v23 }
 0x557   :  { %v435_v31 = vsel %vm432_vm8, %v434_v27, %v430_v26  ;;  %v496_v47 = vmul.f32 %v493_v21, %v1847_v41 }
 0x558   :  { %v438_v42 = vmul.f32 %v435_v31, %v1843_v28  ;;  %v68_v28 = vld [vmem:[%s2076_s0 + $0x18] sm:$0xff] }
 0x559   :  { %1387 = vmatmul.msk.f32.gmra.mxu0 %vm78_vm1, %v68_v28 }
 0x5ad   :  { %v499_v20 = vpop.permute.xlu1 %498 }
 0x5ae   :  { %v501_v22 = vmul.f32 %v499_v20, %v493_v21 }
 0x5b0   :  { %503 = vrot.lane.b32.xlu0 %v501_v22, %s1658_s11 }
 0x5b5   :  { %v441_v29 = vpop.permute.xlu0 %440 }
 0x5b6   :  { %v443_v38 = vmul.f32 %v441_v29, %v435_v31 }
 0x5b8   :  { %445 = vrot.lane.b32.xlu2 %v443_v38, %s1658_s11 }
 0x5d6   :  { %v133_v55 = vpop.f32.mrf.mxu0 }
 0x5d7   :  { %v134_v56 = vadd.f32 %v1759_v7, %v133_v55 }
 0x612   :  { %v446_v43 = vpop.permute.xlu2 %445 }
 0x613   :  { %v1880_v44 = vadd.f32 %v446_v43, %v438_v42 }
 0x615   :  { %1478 = vtanh.f32 %v1880_v44 }
 0x61b   :  { %v1479_v46 = vpop.eup %1478 }
 0x61c   :  { %451 = vrot.lane.b32.xlu1 %v1479_v46, %s1657_s10 }
 0x622   :  { %v504_v30 = vpop.permute.xlu0 %503 }
 0x623   :  { %v1885_v48 = vadd.f32 %v504_v30, %v496_v47 }
 0x625   :  { %1480 = vtanh.f32 %v1885_v48 }
 0x62b   :  { %v1481_v49 = vpop.eup %1480 }
 0x62c   :  { %509 = vrot.lane.b32.xlu2 %v1481_v49, %s1657_s10 }
 0x686   :  { %v510_v50 = vpop.permute.xlu2 %509 }
 0x687   :  { %v512_v51 = vmul.f32 %v510_v50, %v493_v21 }
 0x689   :  { %539 = vrot.lane.b32.xlu1 %v512_v51, %s1658_s11 }
 0x68e   :  { %v452_v52 = vpop.permute.xlu1 %451 }
 0x68f   :  { %v454_v41 = vmul.f32 %v452_v52, %v435_v31 }
 0x691   :  { %514 = vrot.lane.b32.xlu0 %v454_v41, %s1658_s11 }
 0x6fb   :  { %v540_v53 = vpop.permute.xlu1 %539 }
 0x6fc   :  { %1403 = vmatmul.msk.f32.vlgmr.msra.gmra.mxu3 %vm164_vm6, %v540_v53  ;;  %1405 = vmatmul.msk.f32.vlgmr.msrb.gmra.mxu1 %vm164_vm6, %v540_v53 }
 0x6fd   :  { %847 = vmatpush.msra.mxu3 %v1773_v33  ;;  %905 = vmatpush.msrb.mxu1 %v1719_v0 }
 0x6ff   :  { %848 = vmatpush.msra.mxu3 %v1782_v35  ;;  %906 = vmatpush.msrb.mxu1 %v1724_v1 }
 0x701   :  { %849 = vmatpush.msra.mxu3 %v1789_v37  ;;  %907 = vmatpush.msrb.mxu1 %v1736_v4 }
 0x703   :  { %v515_v54 = vpop.permute.xlu0 %514  ;;  %850 = vmatpush.msra.mxu3 %v1802_v40  ;;  %908 = vmatpush.msrb.mxu1 %v1743_v5 }
 0x704   :  { %1402 = vmatmul.msk.f32.vlgmr.msra.gmra.mxu2 %vm164_vm6, %v515_v54 }
 0x705   :  { %822 = vmatpush.msra.mxu2 %v1768_v32 }
 0x707   :  { %823 = vmatpush.msra.mxu2 %v1775_v34 }
 0x709   :  { %824 = vmatpush.msra.mxu2 %v1784_v36 }
 0x70b   :  { %825 = vmatpush.msra.mxu2 %v1797_v39 }
 0x779   :  { %v618_v57 = vpop.f32.mrf.mxu1 }
 0x77a   :  { %v621_v58 = vadd.f32 %v618_v57, %v134_v56 }
 0x77c   :  { %1482 = vtanh.f32 %v621_v58  ;;  %v1406_v6 = vmul.f32 -1.442695, %v621_v58 }
 0x77f   :  { %v560_v60 = vpop.f32.mrf.mxu3 }
 0x782   :  { %v1483_v59 = vpop.eup %1482 }
 0x783   :  { %644 = vrot.lane.b32.xlu0 %v1483_v59, %s1657_s10 }
 0x787   :  { %v535_v61 = vpop.f32.mrf.mxu2 }
 0x788   :  { %v561_v62 = vadd.f32 %v560_v60, %v535_v61 }
 0x78a   :  { %v563_v63 = vadd.f32 %v1835_v45, %v561_v62 }
 0x78c   :  { %1484 = vtanh.f32 %v563_v63  ;;  %v1404_v3 = vmul.f32 -1.442695, %v563_v63 }
 0x78e   :  { %1486 = vpow2.f32 %v1404_v3 }
 0x78f   :  { %1488 = vpow2.f32 %v1406_v6 }
 0x792   :  { %v1485_v2 = vpop.eup %1484 }
 0x793   :  { %586 = vrot.lane.b32.xlu2 %v1485_v2, %s1657_s10 }
 0x794   :  { %v1487_v8 = vpop.eup %1486 }
 0x795   :  { %v567_v9 = vadd.f32 1.0, %v1487_v8  ;;  %v1489_v10 = vpop.eup %1488 }
 0x796   :  { %v625_v11 = vadd.f32 1.0, %v1489_v10 }
 0x797   :  { %1490 = vrcp.f32 %v567_v9  ;;  %v579_v20 = vand.u32 2147483648, %v567_v9  ;;  %vm573_vm10 = vweird.f32 %v567_v9  ;;  %v577_v21 = vand.u32 2147483647, %v567_v9 }
 0x798   :  { %1492 = vrcp.f32 %v625_v11  ;;  %v637_v31 = vand.u32 2147483648, %v625_v11  ;;  %vm631_vm14 = vweird.f32 %v625_v11  ;;  %v635_v38 = vand.u32 2147483647, %v625_v11 }
 0x799   :  { %v580_v24 = vor.u32 1.1754944e-38, %v579_v20  ;;  %vm578_vm12 = vcmp.eq.f32.partialorder %v577_v21, 8.507059e+37 }
 0x79a   :  { %v638_v43 = vor.u32 1.1754944e-38, %v637_v31  ;;  %vm636_vm0 = vcmp.eq.f32.partialorder %v635_v38, 8.507059e+37 }
 0x79d   :  { %v1491_v12 = vpop.eup %1490 }
 0x79e   :  { %v569_v13 = vmul.f32 %v1491_v12, %v567_v9  ;;  %v1493_v15 = vpop.eup %1492  ;;  %vm574_vm9 = vweird.f32 %v1491_v12 }
 0x79f   :  { %v627_v17 = vmul.f32 %v1493_v15, %v625_v11  ;;  %vm575_vm11 = vmor %vm573_vm10, %vm574_vm9  ;;  %vm632_vm13 = vweird.f32 %v1493_v15 }
 0x7a0   :  { %v570_v14 = vsub.f32 1.0, %v569_v13  ;;  %vm633_vm15 = vmor %vm631_vm14, %vm632_vm13 }
 0x7a1   :  { %v628_v19 = vsub.f32 1.0, %v627_v17 }
 0x7a2   :  { %v571_v16 = vmul.f32 %v1491_v12, %v570_v14 }
 0x7a3   :  { %v629_v23 = vmul.f32 %v1493_v15, %v628_v19 }
 0x7a4   :  { %v572_v18 = vadd.f32 %v1491_v12, %v571_v16 }
 0x7a5   :  { %v630_v29 = vadd.f32 %v1493_v15, %v629_v23 }
 0x7a6   :  { %v576_v22 = vsel %vm575_vm11, %v1491_v12, %v572_v18 }
 0x7a7   :  { %v581_v26 = vsel %vm578_vm12, %v580_v24, %v576_v22  ;;  %v634_v42 = vsel %vm633_vm15, %v1493_v15, %v630_v29 }
 0x7a8   :  { %v639_v47 = vsel %vm636_vm0, %v638_v43, %v634_v42  ;;  %v584_v52 = vmul.f32 %v581_v26, %v1880_v44  ;;  %v69_v44 = vld [vmem:[%s2076_s0 + $0x20] sm:$0xff] }
 0x7a9   :  { %v642_v49 = vmul.f32 %v639_v47, %v1885_v48  ;;  %1388 = vmatmul.msk.f32.gmra.mxu0 %vm78_vm1, %v69_v44 }
 0x7ed   :  { %v587_v25 = vpop.permute.xlu2 %586 }
 0x7ee   :  { %v589_v27 = vmul.f32 %v587_v25, %v581_v26 }
 0x7f0   :  { %591 = vrot.lane.b32.xlu1 %v589_v27, %s1658_s11 }
 0x7f5   :  { %v645_v46 = vpop.permute.xlu0 %644 }
 0x7f6   :  { %v647_v30 = vmul.f32 %v645_v46, %v639_v47 }
 0x7f8   :  { %649 = vrot.lane.b32.xlu2 %v647_v30, %s1658_s11 }
 0x826   :  { %v136_v60 = vpop.f32.mrf.mxu0 }
 0x827   :  { %v137_v61 = vadd.f32 %v1759_v7, %v136_v60 }
 0x852   :  { %v650_v28 = vpop.permute.xlu2 %649 }
 0x853   :  { %v1917_v50 = vadd.f32 %v650_v28, %v642_v49 }
 0x855   :  { %1494 = vtanh.f32 %v1917_v50 }
 0x85b   :  { %v1495_v51 = vpop.eup %1494 }
 0x85c   :  { %655 = vrot.lane.b32.xlu1 %v1495_v51, %s1657_s10 }
 0x862   :  { %v592_v41 = vpop.permute.xlu1 %591 }
 0x863   :  { %v1922_v53 = vadd.f32 %v592_v41, %v584_v52 }
 0x865   :  { %1496 = vtanh.f32 %v1922_v53 }
 0x86b   :  { %v1497_v54 = vpop.eup %1496 }
 0x86c   :  { %597 = vrot.lane.b32.xlu0 %v1497_v54, %s1657_s10 }
 0x8ce   :  { %v656_v55 = vpop.permute.xlu1 %655 }
 0x8cf   :  { %v658_v48 = vmul.f32 %v656_v55, %v639_v47 }
 0x8d1   :  { %685 = vrot.lane.b32.xlu0 %v658_v48, %s1658_s11 }
 0x8de   :  { %v598_v56 = vpop.permute.xlu0 %597 }
 0x8df   :  { %v600_v57 = vmul.f32 %v598_v56, %v581_v26 }
 0x8e1   :  { %660 = vrot.lane.b32.xlu2 %v600_v57, %s1658_s11 }
 0x93b   :  { %v661_v58 = vpop.permute.xlu2 %660 }
 0x93c   :  { %1407 = vmatmul.msk.f32.vlgmr.msrb.gmra.mxu2 %vm164_vm6, %v661_v58 }
 0x93d   :  { %968 = vmatpush.msrb.mxu2 %v1768_v32 }
 0x93f   :  { %969 = vmatpush.msrb.mxu2 %v1775_v34 }
 0x941   :  { %970 = vmatpush.msrb.mxu2 %v1784_v36 }
 0x943   :  { %v686_v59 = vpop.permute.xlu0 %685  ;;  %971 = vmatpush.msrb.mxu2 %v1797_v39 }
 0x944   :  { %1408 = vmatmul.msk.f32.vlgmr.msrb.gmra.mxu3 %vm164_vm6, %v686_v59  ;;  %1410 = vmatmul.msk.f32.vlgmr.msra.gmra.mxu1 %vm164_vm6, %v686_v59 }
 0x945   :  { %993 = vmatpush.msrb.mxu3 %v1773_v33  ;;  %1051 = vmatpush.msra.mxu1 %v1719_v0 }
 0x947   :  { %994 = vmatpush.msrb.mxu3 %v1782_v35  ;;  %1052 = vmatpush.msra.mxu1 %v1724_v1 }
 0x949   :  { %995 = vmatpush.msrb.mxu3 %v1789_v37  ;;  %1053 = vmatpush.msra.mxu1 %v1736_v4 }
 0x94b   :  { %996 = vmatpush.msrb.mxu3 %v1802_v40  ;;  %1054 = vmatpush.msra.mxu1 %v1743_v5 }
 0x9bf   :  { %v681_v2 = vpop.f32.mrf.mxu2 }
 0x9c1   :  { %v764_v62 = vpop.f32.mrf.mxu1 }
 0x9c2   :  { %v767_v63 = vadd.f32 %v764_v62, %v137_v61 }
 0x9c4   :  { %1498 = vtanh.f32 %v767_v63  ;;  %v1411_v11 = vmul.f32 -1.442695, %v767_v63 }
 0x9c7   :  { %v706_v3 = vpop.f32.mrf.mxu3 }
 0x9c8   :  { %v707_v6 = vadd.f32 %v706_v3, %v681_v2 }
 0x9ca   :  { %v1499_v8 = vpop.eup %1498  ;;  %v709_v9 = vadd.f32 %v1835_v45, %v707_v6 }
 0x9cb   :  { %790 = vrot.lane.b32.xlu2 %v1499_v8, %s1657_s10 }
 0x9cc   :  { %1500 = vtanh.f32 %v709_v9  ;;  %v1409_v17 = vmul.f32 -1.442695, %v709_v9 }
 0x9cd   :  { %1502 = vpow2.f32 %v1411_v11 }
 0x9d2   :  { %v1501_v10 = vpop.eup %1500 }
 0x9d3   :  { %732 = vrot.lane.b32.xlu1 %v1501_v10, %s1657_s10  ;;  %v1503_v12 = vpop.eup %1502 }
 0x9d4   :  { %v771_v13 = vadd.f32 1.0, %v1503_v12 }
 0x9d6   :  { %1504 = vrcp.f32 %v771_v13  ;;  %v783_v20 = vand.u32 2147483648, %v771_v13  ;;  %vm777_vm3 = vweird.f32 %v771_v13  ;;  %v781_v21 = vand.u32 2147483647, %v771_v13 }
 0x9d7   :  { %1506 = vpow2.f32 %v1409_v17 }
 0x9d8   :  { %v784_v24 = vor.u32 1.1754944e-38, %v783_v20  ;;  %vm782_vm5 = vcmp.eq.f32.partialorder %v781_v21, 8.507059e+37 }
 0x9dc   :  { %v1505_v14 = vpop.eup %1504 }
 0x9dd   :  { %v773_v15 = vmul.f32 %v1505_v14, %v771_v13  ;;  %vm778_vm2 = vweird.f32 %v1505_v14  ;;  %v1507_v22 = vpop.eup %1506 }
 0x9de   :  { %vm779_vm4 = vmor %vm777_vm3, %vm778_vm2  ;;  %v713_v25 = vadd.f32 1.0, %v1507_v22 }
 0x9df   :  { %v774_v16 = vsub.f32 1.0, %v773_v15 }
 0x9e0   :  { %1508 = vrcp.f32 %v713_v25  ;;  %v725_v47 = vand.u32 2147483648, %v713_v25  ;;  %vm719_vm8 = vweird.f32 %v713_v25  ;;  %v723_v30 = vand.u32 2147483647, %v713_v25 }
 0x9e1   :  { %v775_v18 = vmul.f32 %v1505_v14, %v774_v16 }
 0x9e2   :  { %v726_v28 = vor.u32 1.1754944e-38, %v725_v47  ;;  %vm724_vm10 = vcmp.eq.f32.partialorder %v723_v30, 8.507059e+37 }
 0x9e3   :  { %v776_v19 = vadd.f32 %v1505_v14, %v775_v18 }
 0x9e5   :  { %v780_v23 = vsel %vm779_vm4, %v1505_v14, %v776_v19 }
 0x9e6   :  { %v785_v27 = vsel %vm782_vm5, %v784_v24, %v780_v23  ;;  %v1509_v31 = vpop.eup %1508 }
 0x9e7   :  { %v715_v38 = vmul.f32 %v1509_v31, %v713_v25  ;;  %vm720_vm7 = vweird.f32 %v1509_v31  ;;  %v788_v54 = vmul.f32 %v785_v27, %v1917_v50  ;;  %v70_v50 = vld [vmem:[%s2076_s0 + $0x28] sm:$0xff] }
 0x9e8   :  { %vm721_vm9 = vmor %vm719_vm8, %vm720_vm7  ;;  %1389 = vmatmul.msk.f32.gmra.mxu0 %vm78_vm1, %v70_v50 }
 0x9e9   :  { %v716_v42 = vsub.f32 1.0, %v715_v38 }
 0x9eb   :  { %v717_v43 = vmul.f32 %v1509_v31, %v716_v42 }
 0x9ed   :  { %v718_v46 = vadd.f32 %v1509_v31, %v717_v43 }
 0x9ef   :  { %v722_v49 = vsel %vm721_vm9, %v1509_v31, %v718_v46 }
 0x9f0   :  { %v727_v52 = vsel %vm724_vm10, %v726_v28, %v722_v49 }
 0x9f1   :  { %v730_v57 = vmul.f32 %v727_v52, %v1922_v53 }
 0xa25   :  { %v791_v26 = vpop.permute.xlu2 %790 }
 0xa26   :  { %v793_v29 = vmul.f32 %v791_v26, %v785_v27 }
 0xa28   :  { %795 = vrot.lane.b32.xlu1 %v793_v29, %s1658_s11 }
 0xa45   :  { %v733_v51 = vpop.permute.xlu1 %732 }
 0xa46   :  { %v735_v41 = vmul.f32 %v733_v51, %v727_v52 }
 0xa48   :  { %737 = vrot.lane.b32.xlu0 %v735_v41, %s1658_s11 }
 0xa9a   :  { %v796_v55 = vpop.permute.xlu1 %795 }
 0xa9b   :  { %v1954_v48 = vadd.f32 %v796_v55, %v788_v54 }
 0xa9d   :  { %1510 = vtanh.f32 %v1954_v48 }
 0xaa3   :  { %v1511_v56 = vpop.eup %1510 }
 0xaa4   :  { %801 = vrot.lane.b32.xlu0 %v1511_v56, %s1657_s10 }
 0xaba   :  { %v738_v44 = vpop.permute.xlu0 %737 }
 0xabb   :  { %v1959_v58 = vadd.f32 %v738_v44, %v730_v57 }
 0xabd   :  { %1512 = vtanh.f32 %v1959_v58 }
 0xac3   :  { %v1513_v59 = vpop.eup %1512 }
 0xac4   :  { %743 = vrot.lane.b32.xlu2 %v1513_v59, %s1657_s10 }
 0xb16   :  { %v802_v60 = vpop.permute.xlu0 %801 }
 0xb17   :  { %v804_v61 = vmul.f32 %v802_v60, %v785_v27  ;;  %v71_v60 = vld [vmem:[%s2076_s0 + $0x30] sm:$0xff] }
 0xb18   :  { %1390 = vmatmul.msk.f32.gmra.mxu0 %vm78_vm1, %v71_v60 }
 0xb19   :  { %831 = vrot.lane.b32.xlu2 %v804_v61, %s1658_s11 }
 0xb1e   :  { %v744_v62 = vpop.permute.xlu2 %743 }
 0xb1f   :  { %v746_v53 = vmul.f32 %v744_v62, %v727_v52 }
 0xb21   :  { %806 = vrot.lane.b32.xlu1 %v746_v53, %s1658_s11 }
 0xb73   :  { %v832_v63 = vpop.permute.xlu2 %831 }
 0xb74   :  { %1413 = vmatmul.msk.f32.vlgmr.msra.gmra.mxu3 %vm164_vm6, %v832_v63  ;;  %1415 = vmatmul.msk.f32.vlgmr.msrb.gmra.mxu1 %vm164_vm6, %v832_v63  ;;  %v1570_v63 = vld [vmem:[#allocation2 + $0x18] sm:$0xff] }
 0xb75   :  { %1139 = vmatpush.msra.mxu3 %v1773_v33  ;;  %1197 = vmatpush.msrb.mxu1 %v1719_v0  ;;  %v139_v0 = vpop.f32.mrf.mxu0 }
 0xb77   :  { %1140 = vmatpush.msra.mxu3 %v1782_v35  ;;  %1198 = vmatpush.msrb.mxu1 %v1724_v1  ;;  %v140_v1 = vadd.f32 %v1759_v7, %v139_v0 }
 0xb79   :  { %1141 = vmatpush.msra.mxu3 %v1789_v37  ;;  %1199 = vmatpush.msrb.mxu1 %v1736_v4 }
 0xb7b   :  { %1142 = vmatpush.msra.mxu3 %v1802_v40  ;;  %1200 = vmatpush.msrb.mxu1 %v1743_v5 }
 0xb93   :  { %v807_v2 = vpop.permute.xlu1 %806 }
 0xb94   :  { %1412 = vmatmul.msk.f32.vlgmr.msra.gmra.mxu2 %vm164_vm6, %v807_v2  ;;  %v1571_v2 = vld [vmem:[#allocation2 + $0x10] sm:$0xff] }
 0xb95   :  { %1114 = vmatpush.msra.mxu2 %v1768_v32  ;;  %v142_v0 = vpop.f32.mrf.mxu0 }
 0xb97   :  { %1115 = vmatpush.msra.mxu2 %v1775_v34 }
 0xb99   :  { %1116 = vmatpush.msra.mxu2 %v1784_v36 }
 0xb9b   :  { %1117 = vmatpush.msra.mxu2 %v1797_v39 }
 0xbf1   :  { %v910_v3 = vpop.f32.mrf.mxu1 }
 0xbf2   :  { %v913_v4 = vadd.f32 %v910_v3, %v140_v1 }
 0xbf4   :  { %1514 = vtanh.f32 %v913_v4  ;;  %v1416_v10 = vmul.f32 -1.442695, %v913_v4 }
 0xbf7   :  { %v852_v5 = vpop.f32.mrf.mxu3 }
 0xbfa   :  { %v1515_v6 = vpop.eup %1514 }
 0xbfb   :  { %936 = vrot.lane.b32.xlu1 %v1515_v6, %s1657_s10 }
 0xc17   :  { %v827_v8 = vpop.f32.mrf.mxu2 }
 0xc18   :  { %v853_v9 = vadd.f32 %v852_v5, %v827_v8 }
 0xc1a   :  { %v855_v32 = vadd.f32 %v1835_v45, %v853_v9 }
 0xc1c   :  { %1516 = vtanh.f32 %v855_v32  ;;  %v1414_v18 = vmul.f32 -1.442695, %v855_v32 }
 0xc1d   :  { %1518 = vpow2.f32 %v1416_v10 }
 0xc22   :  { %v1517_v34 = vpop.eup %1516 }
 0xc23   :  { %878 = vrot.lane.b32.xlu0 %v1517_v34, %s1657_s10  ;;  %v1519_v11 = vpop.eup %1518 }
 0xc24   :  { %v917_v12 = vadd.f32 1.0, %v1519_v11 }
 0xc26   :  { %1520 = vrcp.f32 %v917_v12  ;;  %v929_v17 = vand.u32 2147483648, %v917_v12  ;;  %vm923_vm12 = vweird.f32 %v917_v12  ;;  %v927_v19 = vand.u32 2147483647, %v917_v12 }
 0xc27   :  { %1522 = vpow2.f32 %v1414_v18 }
 0xc28   :  { %v930_v21 = vor.u32 1.1754944e-38, %v929_v17  ;;  %vm928_vm14 = vcmp.eq.f32.partialorder %v927_v19, 8.507059e+37 }
 0xc2c   :  { %v1521_v7 = vpop.eup %1520 }
 0xc2d   :  { %v919_v13 = vmul.f32 %v1521_v7, %v917_v12  ;;  %vm924_vm11 = vweird.f32 %v1521_v7  ;;  %v1523_v25 = vpop.eup %1522 }
 0xc2e   :  { %vm925_vm13 = vmor %vm923_vm12, %vm924_vm11  ;;  %v859_v26 = vadd.f32 1.0, %v1523_v25 }
 0xc2f   :  { %v920_v14 = vsub.f32 1.0, %v919_v13 }
 0xc30   :  { %1524 = vrcp.f32 %v859_v26  ;;  %v871_v43 = vand.u32 2147483648, %v859_v26  ;;  %vm865_vm0 = vweird.f32 %v859_v26  ;;  %v869_v46 = vand.u32 2147483647, %v859_v26 }
 0xc31   :  { %v921_v15 = vmul.f32 %v1521_v7, %v920_v14 }
 0xc32   :  { %v872_v30 = vor.u32 1.1754944e-38, %v871_v43  ;;  %vm870_vm3 = vcmp.eq.f32.partialorder %v869_v46, 8.507059e+37 }
 0xc33   :  { %v922_v16 = vadd.f32 %v1521_v7, %v921_v15 }
 0xc35   :  { %v926_v20 = vsel %vm925_vm13, %v1521_v7, %v922_v16 }
 0xc36   :  { %v931_v23 = vsel %vm928_vm14, %v930_v21, %v926_v20  ;;  %v1525_v27 = vpop.eup %1524 }
 0xc37   :  { %v861_v29 = vmul.f32 %v1525_v27, %v859_v26  ;;  %vm866_vm15 = vweird.f32 %v1525_v27  ;;  %v934_v52 = vmul.f32 %v931_v23, %v1954_v48 }
 0xc38   :  { %vm867_vm2 = vmor %vm865_vm0, %vm866_vm15 }
 0xc39   :  { %v862_v31 = vsub.f32 1.0, %v861_v29 }
 0xc3b   :  { %v863_v38 = vmul.f32 %v1525_v27, %v862_v31 }
 0xc3d   :  { %v864_v42 = vadd.f32 %v1525_v27, %v863_v38 }
 0xc3f   :  { %v868_v47 = vsel %vm867_vm2, %v1525_v27, %v864_v42 }
 0xc40   :  { %v873_v28 = vsel %vm870_vm3, %v872_v30, %v868_v47 }
 0xc41   :  { %v876_v56 = vmul.f32 %v873_v28, %v1959_v58 }
 0xc6d   :  { %v937_v22 = vpop.permute.xlu1 %936 }
 0xc6e   :  { %v939_v24 = vmul.f32 %v937_v22, %v931_v23 }
 0xc70   :  { %941 = vrot.lane.b32.xlu0 %v939_v24, %s1658_s11 }
 0xc95   :  { %v879_v49 = vpop.permute.xlu0 %878 }
 0xc96   :  { %v881_v51 = vmul.f32 %v879_v49, %v873_v28 }
 0xc98   :  { %883 = vrot.lane.b32.xlu2 %v881_v51, %s1658_s11 }
 0xce2   :  { %v942_v41 = vpop.permute.xlu0 %941 }
 0xce3   :  { %v1991_v54 = vadd.f32 %v942_v41, %v934_v52 }
 0xce5   :  { %1526 = vtanh.f32 %v1991_v54 }
 0xceb   :  { %v1527_v55 = vpop.eup %1526 }
 0xcec   :  { %947 = vrot.lane.b32.xlu2 %v1527_v55, %s1657_s10 }
 0xcf2   :  { %v884_v57 = vpop.permute.xlu2 %883 }
 0xcf3   :  { %v1996_v44 = vadd.f32 %v884_v57, %v876_v56  ;;  %v72_v56 = vld [vmem:[%s2076_s0 + $0x38] sm:$0xff] }
 0xcf4   :  { %1391 = vmatmul.msk.f32.gmra.mxu0 %vm78_vm1, %v72_v56 }
 0xcf5   :  { %1528 = vtanh.f32 %v1996_v44 }
 0xcfb   :  { %v1529_v59 = vpop.eup %1528 }
 0xcfc   :  { %889 = vrot.lane.b32.xlu1 %v1529_v59, %s1657_s10 }
 0xd46   :  { %v948_v50 = vpop.permute.xlu2 %947 }
 0xd47   :  { %v950_v48 = vmul.f32 %v948_v50, %v931_v23 }
 0xd49   :  { %977 = vrot.lane.b32.xlu1 %v950_v48, %s1658_s11 }
 0xd6e   :  { %v890_v61 = vpop.permute.xlu1 %889 }
 0xd6f   :  { %v892_v58 = vmul.f32 %v890_v61, %v873_v28 }
 0xd71   :  { %952 = vrot.lane.b32.xlu0 %v892_v58, %s1658_s11  ;;  %v145_v48 = vpop.f32.mrf.mxu0 }
 0xdbb   :  { %v978_v62 = vpop.permute.xlu1 %977 }
 0xdbc   :  { %1418 = vmatmul.msk.f32.vlgmr.msrb.gmra.mxu3 %vm164_vm6, %v978_v62  ;;  %1420 = vmatmul.msk.f32.vlgmr.msra.gmra.mxu1 %vm164_vm6, %v978_v62 }
 0xdbd   :  { %1285 = vmatpush.msrb.mxu3 %v1773_v33  ;;  %v2018_v33 = vld [vmem:[%s2078_s2] ss:$0 sm:$0xff] }
 0xdbe   :  { %v146_v60 = vadd.f32 %v2018_v33, %v145_v48 }
 0xdbf   :  { %1286 = vmatpush.msrb.mxu3 %v1782_v35  ;;  %v143_v35 = vadd.f32 %v2018_v33, %v142_v0  ;;  %v2050_v0 = vld [vmem:[%s2082_s6] ss:$0 sm:$0xff] }
 0xdc1   :  { %1287 = vmatpush.msrb.mxu3 %v1789_v37 }
 0xdc3   :  { %1288 = vmatpush.msrb.mxu3 %v1802_v40 }
 0xde3   :  { %v953_v53 = vpop.permute.xlu0 %952 }
 0xde4   :  { %1417 = vmatmul.msk.f32.vlgmr.msrb.gmra.mxu2 %vm164_vm6, %v953_v53 }
 0xde5   :  { %1260 = vmatpush.msrb.mxu2 %v1570_v63 }
 0xde7   :  { %1261 = vmatpush.msrb.mxu2 %v1571_v2 }
 0xde9   :  { %1262 = vmatpush.msrb.mxu2 %v1784_v36 }
 0xdeb   :  { %1263 = vmatpush.msrb.mxu2 %v1797_v39 }
 0xe39   :  { %v1056_v37 = vpop.f32.mrf.mxu1 }
 0xe3a   :  { %v1059_v40 = vadd.f32 %v1056_v37, %v143_v35 }
 0xe3c   :  { %1530 = vtanh.f32 %v1059_v40  ;;  %v1421_v5 = vmul.f32 -1.442695, %v1059_v40 }
 0xe3f   :  { %v998_v3 = vpop.f32.mrf.mxu3 }
 0xe42   :  { %v1531_v1 = vpop.eup %1530 }
 0xe43   :  { %1082 = vrot.lane.b32.xlu0 %v1531_v1, %s1657_s10 }
 0xe67   :  { %v973_v4 = vpop.f32.mrf.mxu2 }
 0xe68   :  { %v999_v6 = vadd.f32 %v998_v3, %v973_v4 }
 0xe6a   :  { %v1001_v36 = vadd.f32 %v1835_v45, %v999_v6 }
 0xe6c   :  { %1532 = vtanh.f32 %v1001_v36  ;;  %v1419_v34 = vmul.f32 -1.442695, %v1001_v36 }
 0xe6d   :  { %1534 = vpow2.f32 %v1421_v5 }
 0xe72   :  { %v1533_v39 = vpop.eup %1532 }
 0xe73   :  { %1024 = vrot.lane.b32.xlu2 %v1533_v39, %s1657_s10  ;;  %v1535_v8 = vpop.eup %1534 }
 0xe74   :  { %v1063_v9 = vadd.f32 1.0, %v1535_v8 }
 0xe76   :  { %1536 = vrcp.f32 %v1063_v9  ;;  %v1075_v45 = vand.u32 2147483648, %v1063_v9  ;;  %vm1069_vm5 = vweird.f32 %v1063_v9  ;;  %v1073_v15 = vand.u32 2147483647, %v1063_v9 }
 0xe77   :  { %1538 = vpow2.f32 %v1419_v34 }
 0xe78   :  { %v1076_v17 = vor.u32 1.1754944e-38, %v1075_v45  ;;  %vm1074_vm8 = vcmp.eq.f32.partialorder %v1073_v15, 8.507059e+37 }
 0xe7c   :  { %v1537_v32 = vpop.eup %1536 }
 0xe7d   :  { %v1065_v10 = vmul.f32 %v1537_v32, %v1063_v9  ;;  %v1539_v12 = vpop.eup %1538  ;;  %vm1070_vm4 = vweird.f32 %v1537_v32 }
 0xe7e   :  { %v1005_v13 = vadd.f32 1.0, %v1539_v12  ;;  %vm1071_vm7 = vmor %vm1069_vm5, %vm1070_vm4 }
 0xe7f   :  { %v1066_v11 = vsub.f32 1.0, %v1065_v10 }
 0xe80   :  { %1540 = vrcp.f32 %v1005_v13  ;;  %v1017_v26 = vand.u32 2147483648, %v1005_v13  ;;  %vm1011_vm10 = vweird.f32 %v1005_v13  ;;  %v1015_v27 = vand.u32 2147483647, %v1005_v13 }
 0xe81   :  { %v1067_v7 = vmul.f32 %v1537_v32, %v1066_v11 }
 0xe82   :  { %v1018_v31 = vor.u32 1.1754944e-38, %v1017_v26  ;;  %vm1016_vm12 = vcmp.eq.f32.partialorder %v1015_v27, 8.507059e+37 }
 0xe83   :  { %v1068_v14 = vadd.f32 %v1537_v32, %v1067_v7 }
 0xe85   :  { %v1072_v16 = vsel %vm1071_vm7, %v1537_v32, %v1068_v14 }
 0xe86   :  { %v1077_v19 = vsel %vm1074_vm8, %v1076_v17, %v1072_v16  ;;  %v1541_v21 = vpop.eup %1540 }
 0xe87   :  { %v1007_v22 = vmul.f32 %v1541_v21, %v1005_v13  ;;  %vm1012_vm9 = vweird.f32 %v1541_v21  ;;  %v1080_v46 = vmul.f32 %v1077_v19, %v1991_v54 }
 0xe88   :  { %vm1013_vm11 = vmor %vm1011_vm10, %vm1012_vm9 }
 0xe89   :  { %v1008_v23 = vsub.f32 1.0, %v1007_v22 }
 0xe8b   :  { %v1009_v24 = vmul.f32 %v1541_v21, %v1008_v23 }
 0xe8d   :  { %v1010_v25 = vadd.f32 %v1541_v21, %v1009_v24 }
 0xe8f   :  { %v1014_v29 = vsel %vm1013_vm11, %v1541_v21, %v1010_v25 }
 0xe90   :  { %v1019_v42 = vsel %vm1016_vm12, %v1018_v31, %v1014_v29 }
 0xe91   :  { %v1022_v28 = vmul.f32 %v1019_v42, %v1996_v44 }
 0xeb5   :  { %v1083_v18 = vpop.permute.xlu0 %1082 }
 0xeb6   :  { %v1085_v20 = vmul.f32 %v1083_v18, %v1077_v19 }
 0xeb8   :  { %1087 = vrot.lane.b32.xlu2 %v1085_v20, %s1658_s11 }
 0xecd   :  { %v1025_v38 = vpop.permute.xlu2 %1024 }
 0xece   :  { %v1027_v43 = vmul.f32 %v1025_v38, %v1019_v42 }
 0xed0   :  { %1029 = vrot.lane.b32.xlu1 %v1027_v43, %s1658_s11 }
 0xf12   :  { %v1088_v47 = vpop.permute.xlu2 %1087 }
 0xf13   :  { %v2027_v30 = vadd.f32 %v1088_v47, %v1080_v46 }
 0xf15   :  { %1542 = vtanh.f32 %v2027_v30 }
 0xf1b   :  { %v1543_v49 = vpop.eup %1542 }
 0xf1c   :  { %1093 = vrot.lane.b32.xlu1 %v1543_v49, %s1657_s10 }
 0xf42   :  { %v1030_v51 = vpop.permute.xlu1 %1029 }
 0xf43   :  { %v2032_v52 = vadd.f32 %v1030_v51, %v1022_v28 }
 0xf45   :  { %1544 = vtanh.f32 %v2032_v52 }
 0xf4b   :  { %v1545_v41 = vpop.eup %1544 }
 0xf4c   :  { %1035 = vrot.lane.b32.xlu0 %v1545_v41, %s1657_s10 }
 0xf8e   :  { %v1094_v55 = vpop.permute.xlu1 %1093 }
 0xf8f   :  { %v1096_v54 = vmul.f32 %v1094_v55, %v1077_v19 }
 0xf91   :  { %1123 = vrot.lane.b32.xlu0 %v1096_v54, %s1658_s11 }
 0xfbe   :  { %v1036_v57 = vpop.permute.xlu0 %1035 }
 0xfbf   :  { %v1038_v44 = vmul.f32 %v1036_v57, %v1019_v42 }
 0xfc1   :  { %1098 = vrot.lane.b32.xlu2 %v1038_v44, %s1658_s11 }
0x1003   :  { %v1124_v59 = vpop.permute.xlu0 %1123 }
0x1004   :  { %1423 = vmatmul.msk.f32.vlgmr.msra.gmra.mxu3 %vm164_vm6, %v1124_v59  ;;  %1425 = vmatmul.msk.f32.vlgmr.msrb.gmra.mxu1 %vm164_vm6, %v1124_v59 }
0x101b   :  { %v1099_v50 = vpop.permute.xlu2 %1098 }
0x101c   :  { %1422 = vmatmul.msk.f32.vlgmr.msra.gmra.mxu2 %vm164_vm6, %v1099_v50 }
0x1081   :  { %v1202_v61 = vpop.f32.mrf.mxu1 }
0x1082   :  { %v1205_v58 = vadd.f32 %v1202_v61, %v146_v60 }
0x1084   :  { %1546 = vtanh.f32 %v1205_v58  ;;  %v1426_v33 = vmul.f32 -1.442695, %v1205_v58 }
0x1087   :  { %v1144_v53 = vpop.f32.mrf.mxu3 }
0x108a   :  { %v1547_v62 = vpop.eup %1546 }
0x108b   :  { %1228 = vrot.lane.b32.xlu2 %v1547_v62, %s1657_s10 }
0x109f   :  { %v1119_v63 = vpop.f32.mrf.mxu2 }
0x10a0   :  { %v1145_v2 = vadd.f32 %v1144_v53, %v1119_v63 }
0x10a2   :  { %v1147_v35 = vadd.f32 %v2050_v0, %v1145_v2 }
0x10a4   :  { %1548 = vtanh.f32 %v1147_v35  ;;  %v1424_v12 = vmul.f32 -1.442695, %v1147_v35 }
0x10a5   :  { %1550 = vpow2.f32 %v1426_v33 }
0x10aa   :  { %v1549_v37 = vpop.eup %1548 }
0x10ab   :  { %1170 = vrot.lane.b32.xlu1 %v1549_v37, %s1657_s10  ;;  %v1551_v40 = vpop.eup %1550 }
0x10ac   :  { %v1209_v1 = vadd.f32 1.0, %v1551_v40 }
0x10ae   :  { %1552 = vrcp.f32 %v1209_v1  ;;  %v1221_v5 = vand.u32 2147483648, %v1209_v1  ;;  %vm1215_vm13 = vweird.f32 %v1209_v1  ;;  %v1219_v8 = vand.u32 2147483647, %v1209_v1 }
0x10af   :  { %1554 = vpow2.f32 %v1424_v12 }
0x10b0   :  { %v1222_v32 = vor.u32 1.1754944e-38, %v1221_v5  ;;  %vm1220_vm15 = vcmp.eq.f32.partialorder %v1219_v8, 8.507059e+37 }
0x10b4   :  { %v1553_v3 = vpop.eup %1552 }
0x10b5   :  { %v1211_v4 = vmul.f32 %v1553_v3, %v1209_v1  ;;  %vm1216_vm1 = vweird.f32 %v1553_v3  ;;  %v1555_v7 = vpop.eup %1554 }
0x10b6   :  { %vm1217_vm14 = vmor %vm1215_vm13, %vm1216_vm1  ;;  %v1151_v13 = vadd.f32 1.0, %v1555_v7 }
0x10b7   :  { %v1212_v6 = vsub.f32 1.0, %v1211_v4  ;;  %v1334_v4 = vld [vmem:[#allocation5 + $0x18] sm:$0xff] }
0x10b8   :  { %1556 = vrcp.f32 %v1151_v13  ;;  %v1163_v18 = vand.u32 2147483648, %v1151_v13  ;;  %vm1157_vm2 = vweird.f32 %v1151_v13  ;;  %v1161_v19 = vand.u32 2147483647, %v1151_v13  ;;  %1356 = vmatpush.msrb.mxu0 %v1334_v4 }
0x10b9   :  { %v1213_v36 = vmul.f32 %v1553_v3, %v1212_v6  ;;  %v1333_v6 = vld [vmem:[#allocation5 + $0x10] sm:$0xff] }
0x10ba   :  { %v1164_v21 = vor.u32 1.1754944e-38, %v1163_v18  ;;  %vm1162_vm4 = vcmp.eq.f32.partialorder %v1161_v19, 8.507059e+37  ;;  %1357 = vmatpush.msrb.mxu0 %v1333_v6 }
0x10bb   :  { %v1214_v39 = vadd.f32 %v1553_v3, %v1213_v36  ;;  %v1332_v36 = vld [vmem:[#allocation5 + $0x8] sm:$0xff] }
0x10bc   :  { %1358 = vmatpush.msrb.mxu0 %v1332_v36 }
0x10bd   :  { %v1218_v9 = vsel %vm1217_vm14, %v1553_v3, %v1214_v39  ;;  %v1331_v39 = vld [vmem:[#allocation5] sm:$0xff] }
0x10be   :  { %v1223_v10 = vsel %vm1220_vm15, %v1222_v32, %v1218_v9  ;;  %v1557_v14 = vpop.eup %1556  ;;  %1359 = vmatpush.msrb.mxu0 %v1331_v39  ;;  %v1441_v32 = vld [vmem:[%s2084_s8] ss:$0 sm:$0xff] }
0x10bf   :  { %v1153_v45 = vmul.f32 %v1557_v14, %v1151_v13  ;;  %vm1158_vm0 = vweird.f32 %v1557_v14  ;;  %v1226_v25 = vmul.f32 %v1223_v10, %v2027_v30 }
0x10c0   :  { %vm1159_vm3 = vmor %vm1157_vm2, %vm1158_vm0 }
0x10c1   :  { %v1154_v15 = vsub.f32 1.0, %v1153_v45 }
0x10c3   :  { %v1155_v16 = vmul.f32 %v1557_v14, %v1154_v15 }
0x10c5   :  { %v1156_v17 = vadd.f32 %v1557_v14, %v1155_v16 }
0x10c7   :  { %v1160_v20 = vsel %vm1159_vm3, %v1557_v14, %v1156_v17 }
0x10c8   :  { %v1165_v23 = vsel %vm1162_vm4, %v1164_v21, %v1160_v20 }
0x10c9   :  { %v1168_v31 = vmul.f32 %v1165_v23, %v2032_v52 }
0x10e5   :  { %v1229_v34 = vpop.permute.xlu2 %1228 }
0x10e6   :  { %v1231_v11 = vmul.f32 %v1229_v34, %v1223_v10 }
0x10e8   :  { %1233 = vrot.lane.b32.xlu1 %v1231_v11, %s1658_s11 }
0x111d   :  { %v1171_v22 = vpop.permute.xlu1 %1170 }
0x111e   :  { %v1173_v24 = vmul.f32 %v1171_v22, %v1165_v23 }
0x1120   :  { %1175 = vrot.lane.b32.xlu0 %v1173_v24, %s1658_s11 }
0x115a   :  { %v1234_v26 = vpop.permute.xlu1 %1233 }
0x115b   :  { %v1236_v27 = vadd.f32 %v1234_v26, %v1226_v25 }
0x115d   :  { %1558 = vtanh.f32 %v1236_v27 }
0x1163   :  { %v1559_v29 = vpop.eup %1558 }
0x1164   :  { %1239 = vrot.lane.b32.xlu0 %v1559_v29, %s1657_s10 }
0x1192   :  { %v1176_v38 = vpop.permute.xlu0 %1175 }
0x1193   :  { %v1178_v42 = vadd.f32 %v1176_v38, %v1168_v31 }
0x1195   :  { %1560 = vtanh.f32 %v1178_v42 }
0x119b   :  { %v1561_v43 = vpop.eup %1560 }
0x119c   :  { %1181 = vrot.lane.b32.xlu2 %v1561_v43, %s1657_s10 }
0x11d6   :  { %v1240_v46 = vpop.permute.xlu0 %1239 }
0x11d7   :  { %v1242_v47 = vmul.f32 %v1240_v46, %v1223_v10 }
0x11d9   :  { %1269 = vrot.lane.b32.xlu2 %v1242_v47, %s1658_s11 }
0x11f6   :  { %v1182_v49 = vpop.permute.xlu2 %1181 }
0x11f7   :  { %v1184_v30 = vmul.f32 %v1182_v49, %v1165_v23 }
0x11f9   :  { %1244 = vrot.lane.b32.xlu1 %v1184_v30, %s1658_s11 }
0x1233   :  { %v1270_v28 = vpop.permute.xlu2 %1269 }
0x1234   :  { %1428 = vmatmul.msk.f32.vlgmr.msrb.gmra.mxu3 %vm164_vm6, %v1270_v28 }
0x126b   :  { %v1245_v51 = vpop.permute.xlu1 %1244 }
0x126c   :  { %1427 = vmatmul.msk.f32.vlgmr.msrb.gmra.mxu2 %vm164_vm6, %v1245_v51 }
0x12b7   :  { %v1290_v52 = vpop.f32.mrf.mxu3 }
0x12ef   :  { %v1265_v41 = vpop.f32.mrf.mxu2 }
0x12f0   :  { %v1291_v55 = vadd.f32 %v1290_v52, %v1265_v41 }
0x12f2   :  { %v1293_v54 = vadd.f32 %v2050_v0, %v1291_v55 }
0x12f4   :  { %1562 = vtanh.f32 %v1293_v54  ;;  %v1429_v57 = vmul.f32 -1.442695, %v1293_v54 }
0x12f6   :  { %1564 = vpow2.f32 %v1429_v57 }
0x12fa   :  { %v1563_v56 = vpop.eup %1562 }
0x12fb   :  { %1316 = vrot.lane.b32.xlu0 %v1563_v56, %s1657_s10 }
0x12fc   :  { %v1565_v44 = vpop.eup %1564 }
0x12fd   :  { %v1297_v59 = vadd.f32 1.0, %v1565_v44 }
0x12ff   :  { %1566 = vrcp.f32 %v1297_v59  ;;  %v1309_v62 = vand.u32 2147483648, %v1297_v59  ;;  %vm1303_vm7 = vweird.f32 %v1297_v59  ;;  %v1307_v53 = vand.u32 2147483647, %v1297_v59 }
0x1301   :  { %v1310_v2 = vor.u32 1.1754944e-38, %v1309_v62  ;;  %vm1308_vm9 = vcmp.eq.f32.partialorder %v1307_v53, 8.507059e+37 }
0x1305   :  { %v1567_v50 = vpop.eup %1566 }
0x1306   :  { %v1299_v48 = vmul.f32 %v1567_v50, %v1297_v59  ;;  %vm1304_vm5 = vweird.f32 %v1567_v50 }
0x1307   :  { %vm1305_vm8 = vmor %vm1303_vm7, %vm1304_vm5 }
0x1308   :  { %v1300_v60 = vsub.f32 1.0, %v1299_v48 }
0x130a   :  { %v1301_v61 = vmul.f32 %v1567_v50, %v1300_v60 }
0x130c   :  { %v1302_v58 = vadd.f32 %v1567_v50, %v1301_v61 }
0x130e   :  { %v1306_v63 = vsel %vm1305_vm8, %v1567_v50, %v1302_v58 }
0x130f   :  { %v1311_v35 = vsel %vm1308_vm9, %v1310_v2, %v1306_v63 }
0x1310   :  { %v1314_v33 = vmul.f32 %v1311_v35, %v1178_v42 }
0x136d   :  { %v1317_v0 = vpop.permute.xlu0 %1316 }
0x136e   :  { %v1319_v37 = vmul.f32 %v1317_v0, %v1311_v35 }
0x1370   :  { %1321 = vrot.lane.b32.xlu1 %v1319_v37, %s1658_s11 }
0x13e2   :  { %v1322_v40 = vpop.permute.xlu1 %1321 }
0x13e3   :  { %v1324_v1 = vadd.f32 %v1322_v40, %v1314_v33 }
0x13e5   :  { %1568 = vtanh.f32 %v1324_v1 }
0x13eb   :  { %v1569_v3 = vpop.eup %1568 }
0x13ec   :  { %1327 = vrot.lane.b32.xlu2 %v1569_v3, %s1657_s10  ;;  %s1659_s10 = smov [#allocation7]  }
0x13ed   :  { %s1370_s15 = sshll.u32 %s1659_s10, 4  ;;  %s1371_s15 = int_to_ptr.vmem [resolvable:$true] %s1370_s15 }
0x1446   :  { %v1328_v5 = vpop.permute.xlu2 %1327 }
0x1447   :  { %v1330_v8 = vmul.f32 %v1328_v5, %v1311_v35 }
0x1449   :  { %1340 = vrot.lane.b32.xlu0 %v1330_v8, %s1658_s11 }
0x14bb   :  { %v1341_v9 = vpop.permute.xlu0 %1340 }
0x14bc   :  { %1430 = vmatmul.msk.f32.vlgmr.msrb.gmra.mxu0 %vm164_vm6, %v1341_v9 }
0x1539   :  { %v1361_v34 = vpop.f32.mrf.mxu0 }
0x153a   :  { %v1362_v10 = vadd.f32 %v1441_v32, %v1361_v34 }
0x153c   :  { %1364 = vst [vmem:[#allocation7] sm:$0xff] %v1362_v10 }
0x153d   :  { %1375 = dma.vmem_to_hbm [thread:$0]  %s1371_s15, 128, %s1373_s18, [#allocation4]  }
0x153e   :  { %1650 = dma.done.wait [#allocation4], 128  }
0x153f   :  { %1651 = vsyncadd [#allocation4], 4294967168 }
0x1540   :  { %1380 = vsyncpa [#allocation3], 1 }
0x1541   :  { %1381 = vsyncpa [#allocation6], 1 }
0x1542   :  { %1382 = vsyncpa [#allocation4], 1 }

</bundles_post_ra>
